<compile_context>
chip_gen: v7x
topology: tpu7x:2x2x1
jax: 0.10.0
libtpu: 0.0.40
codegen_flags: <defaults>
</compile_context>

<pallas_src>
import numpy as np
import jax
import jax.numpy as jnp
from jax.experimental import pallas as pl
from jax.experimental.pallas import tpu as pltpu

# ---------------- model dims (scaled-down, shapes consistent with forward) ----------
C_IN = 3              # RGB input channels
C1 = 8                # first conv block channels
C2 = 16               # second conv block channels
H_IN = W_IN = 16      # input spatial
HID = 64              # classifier hidden width (real VGG: 4096)
NUM_CLASSES = 10      # real VGG default: 1000

L1 = H_IN * W_IN                  # 256 : conv1 spatial length (lane dim)
HH, WH = H_IN // 2, W_IN // 2
L2 = HH * WH                      # 64  : conv2 spatial length (lane dim)
HQ, WQ = HH // 2, WH // 2
L3 = HQ * WQ                      # 16  : pooled spatial after block 2
FEAT_DIM = C2 * L3                # 256 : classifier input (PyTorch NCHW flatten)


# ---------------- host-precomputed constants ----------------------------------------

def _conv_tap_mask(h, w, cin):
    """(9*cin, h*w) 0/1 f32 mask zeroing taps that fall outside the image
    (folds the 'same' zero padding into the value-level tap loads)."""
    L = h * w
    j = np.arange(L)
    y, x = j // w, j % w
    rows = []
    for dy in (-1, 0, 1):
        for dx in (-1, 0, 1):
            ok = (y + dy >= 0) & (y + dy < h) & (x + dx >= 0) & (x + dx < w)
            rows.append(np.repeat(ok[None, :].astype(np.float32), cin, axis=0))
    return np.concatenate(rows, axis=0)


def _pool_select(h, w):
    """(h*w, (h//2)*(w//2)) 0/1 matrix compacting 2x2/2 max-pool results (held at the
    even-row/even-col lanes after two rolled maxes) into a dense row-major map."""
    hh, wh = h // 2, w // 2
    S = np.zeros((h * w, hh * wh), np.float32)
    for k in range(hh * wh):
        S[(2 * (k // wh)) * w + 2 * (k % wh), k] = 1.0
    return S


# ---------------- in-kernel helpers (value-level only, no scratch) -------------------

def _lshift(v, k):
    """Static lane rotation: out[:, j] = v[:, (j + k) % L]  (two slices + concat)."""
    L = v.shape[-1]
    k = k % L
    if k == 0:
        return v
    return jnp.concatenate([v[:, k:], v[:, :k]], axis=1)


def _conv3x3_relu(x, mask, w_mat, b, width):
    """3x3 'same' conv + ReLU in the transposed (channels, H*W) layout.

    x:     (cin, L)  f32 flat feature map (spatial on lanes).
    mask:  (9*cin, L) 0/1 f32 (zero padding folded into the taps).
    w_mat: (cout, 9*cin) bf16, columns ordered (kh, kw, cin).
    b:     (cout, 1) f32.
    Returns (cout, L) f32.
    """
    taps = [_lshift(x, dy * width + dx)
            for dy in (-1, 0, 1) for dx in (-1, 0, 1)]
    col = jnp.concatenate(taps, axis=0) * mask                 # (9*cin, L)
    acc = jnp.dot(w_mat, col.astype(jnp.bfloat16),
                  preferred_element_type=jnp.float32)          # one MXU matmul, N = L
    return jnp.maximum(acc + b, 0.0)


def _pool2x2(y, width, sel):
    """2x2 / stride-2 max pool on a flat (c, L) map: two lane rotations + max, then a
    constant 0/1 selection matmul compacting the valid (even, even) lanes."""
    y = jnp.maximum(y, _lshift(y, 1))        # pool along W (valid at even x)
    y = jnp.maximum(y, _lshift(y, width))    # pool along H (valid at even y)
    return jnp.dot(y.astype(jnp.bfloat16), sel,
                   preferred_element_type=jnp.float32)         # (c, L/4)


# ---------------- fused VGG kernel ----------------------------------------------------

def _vgg_kernel(x_ref, m1_ref, w1_ref, b1_ref, s1_ref,
                m2_ref, w2_ref, b2_ref, s2_ref,
                fw1_ref, fb1_ref, fw2_ref, fb2_ref, fw3_ref, fb3_ref,
                out_ref):
    # ---- features: [conv3x3+ReLU, maxpool2] x 2, activations = (channels, H*W) ------
    x = x_ref[0]                                                         # (C_IN, L1)
    y = _conv3x3_relu(x, m1_ref[...], w1_ref[...], b1_ref[...], W_IN)    # (C1, L1)
    p1 = _pool2x2(y, W_IN, s1_ref[...])                                  # (C1, L2)
    y = _conv3x3_relu(p1, m2_ref[...], w2_ref[...], b2_ref[...], WH)     # (C2, L2)
    p2 = _pool2x2(y, WH, s2_ref[...])                                    # (C2, L3)

    # ---- flatten (PyTorch NCHW x.view(N, -1) order): lane-axis concat of the
    #      per-channel rows -- value level, no feat scratch, no masked partial stores.
    feat = jnp.concatenate([p2[c:c + 1, :] for c in range(C2)], axis=1)  # (1, FEAT)

    # ---- classifier: Linear+ReLU, Dropout(id), Linear+ReLU, Dropout(id), Linear -----
    # TODO(synk): training-mode dropout (random masking) is not implemented.
    a = jnp.dot(feat.astype(jnp.bfloat16), fw1_ref[...],
                preferred_element_type=jnp.float32) + fb1_ref[...]
    a = jnp.maximum(a, 0.0)
    a = jnp.dot(a.astype(jnp.bfloat16), fw2_ref[...],
                preferred_element_type=jnp.float32) + fb2_ref[...]
    a = jnp.maximum(a, 0.0)
    out_ref[0] = jnp.dot(a.astype(jnp.bfloat16), fw3_ref[...],
                         preferred_element_type=jnp.float32) + fb3_ref[...]


# ---------------- host-side wrapper ---------------------------------------------------

def vgg_forward(params, x_nchw):
    n = x_nchw.shape[0]
    x_flat = x_nchw.reshape(n, C_IN, L1)          # (N, C, H*W): spatial on lanes

    # Transposed im2col conv weights: (cout, 9*cin), columns in (kh, kw, cin) order.
    w1 = jnp.transpose(params["conv1_w"], (3, 0, 1, 2)).reshape(C1, 9 * C_IN)
    w2 = jnp.transpose(params["conv2_w"], (3, 0, 1, 2)).reshape(C2, 9 * C1)

    # Host-precomputed constants (folded padding masks + pooling selection matrices).
    m1 = jnp.asarray(_conv_tap_mask(H_IN, W_IN, C_IN))
    m2 = jnp.asarray(_conv_tap_mask(HH, WH, C1))
    s1 = jnp.asarray(_pool_select(H_IN, W_IN), dtype=jnp.bfloat16)
    s2 = jnp.asarray(_pool_select(HH, WH), dtype=jnp.bfloat16)

    vmem = pl.BlockSpec(memory_space=pltpu.MemorySpace.VMEM)   # untiled VMEM resident
    out = pl.pallas_call(
        _vgg_kernel,
        out_shape=jax.ShapeDtypeStruct((n, 1, NUM_CLASSES), jnp.float32),
        grid=(n,),                                 # batch grid -> 2 TCs on v7x
        in_specs=[pl.BlockSpec((1, C_IN, L1), lambda b: (b, 0, 0))] + [vmem] * 14,
        out_specs=pl.BlockSpec((1, 1, NUM_CLASSES), lambda b: (b, 0, 0)),
        compiler_params=pltpu.CompilerParams(dimension_semantics=("parallel",)),
    )(x_flat,
      m1, w1.astype(jnp.bfloat16), params["conv1_b"].reshape(C1, 1), s1,
      m2, w2.astype(jnp.bfloat16), params["conv2_b"].reshape(C2, 1), s2,
      params["fc1_w"].astype(jnp.bfloat16), params["fc1_b"].reshape(1, HID),
      params["fc2_w"].astype(jnp.bfloat16), params["fc2_b"].reshape(1, HID),
      params["fc3_w"].astype(jnp.bfloat16), params["fc3_b"].reshape(1, NUM_CLASSES))
    return out.reshape(n, NUM_CLASSES)


# ---------------- pure-JAX f32 reference (for a loose sanity check) -------------------

def vgg_reference(params, x_nchw):
    dn = ("NCHW", "OIHW", "NCHW")
    w1 = jnp.transpose(params["conv1_w"], (3, 2, 0, 1))
    w2 = jnp.transpose(params["conv2_w"], (3, 2, 0, 1))
    y = jax.lax.conv_general_dilated(x_nchw, w1, (1, 1), ((1, 1), (1, 1)),
                                     dimension_numbers=dn)
    y = jnp.maximum(y + params["conv1_b"][None, :, None, None], 0.0)
    y = jax.lax.reduce_window(y, -jnp.inf, jax.lax.max,
                              (1, 1, 2, 2), (1, 1, 2, 2), "VALID")
    y = jax.lax.conv_general_dilated(y, w2, (1, 1), ((1, 1), (1, 1)),
                                     dimension_numbers=dn)
    y = jnp.maximum(y + params["conv2_b"][None, :, None, None], 0.0)
    y = jax.lax.reduce_window(y, -jnp.inf, jax.lax.max,
                              (1, 1, 2, 2), (1, 1, 2, 2), "VALID")
    f = y.reshape(y.shape[0], -1)                                  # NCHW flatten
    a = jnp.maximum(f @ params["fc1_w"] + params["fc1_b"], 0.0)
    a = jnp.maximum(a @ params["fc2_w"] + params["fc2_b"], 0.0)
    return a @ params["fc3_w"] + params["fc3_b"]


# ---------------- parameter init (matches PyTorch init rules) -------------------------

def init_params(key):
    ks = jax.random.split(key, 5)

    def kaiming_normal_fan_out(k, shape):
        # shape = (kh, kw, cin, cout); fan_out = kh*kw*cout; relu gain = sqrt(2)
        fan_out = shape[0] * shape[1] * shape[3]
        return jax.random.normal(k, shape, jnp.float32) * jnp.sqrt(2.0 / fan_out)

    return {
        "conv1_w": kaiming_normal_fan_out(ks[0], (3, 3, C_IN, C1)),
        "conv1_b": jnp.zeros((C1,), jnp.float32),
        "conv2_w": kaiming_normal_fan_out(ks[1], (3, 3, C1, C2)),
        "conv2_b": jnp.zeros((C2,), jnp.float32),
        # Linear weights ~ N(0, 0.01), stored pre-transposed as (in, out);
        # fc1_w rows follow the PyTorch NCHW-flatten order.
        "fc1_w": jax.random.normal(ks[2], (FEAT_DIM, HID), jnp.float32) * 0.01,
        "fc1_b": jnp.zeros((HID,), jnp.float32),
        "fc2_w": jax.random.normal(ks[3], (HID, HID), jnp.float32) * 0.01,
        "fc2_b": jnp.zeros((HID,), jnp.float32),
        "fc3_w": jax.random.normal(ks[4], (HID, NUM_CLASSES), jnp.float32) * 0.01,
        "fc3_b": jnp.zeros((NUM_CLASSES,), jnp.float32),
    }


if __name__ == "__main__":
    key = jax.random.PRNGKey(0)
    pkey, xkey = jax.random.split(key)
    params = init_params(pkey)
    x = jax.random.normal(xkey, (2, C_IN, H_IN, W_IN), jnp.float32)  # NCHW like PyTorch

    out = jax.block_until_ready(jax.jit(vgg_forward)(params, x))
    assert out.shape == (2, NUM_CLASSES) and out.dtype == jnp.float32

    # Loose sanity check vs. pure-f32 reference (kernel matmuls use bf16 operands).
    ref = jax.block_until_ready(vgg_reference(params, x))
    err = float(jnp.max(jnp.abs(out - ref)))
    tol = 0.05 * float(jnp.max(jnp.abs(ref))) + 1e-4
    assert err <= tol, f"mismatch: max|diff|={err:.3e} tol={tol:.3e}"

    print("KERNEL_OK")
</pallas_src>

<mosaic_0001>
module attributes {stable_mosaic.version = 11 : i64} {
  func.func @_vgg_kernel(%arg0: i32, %arg1: memref<1x3x256xf32, #tpu.memory_space<vmem>>, %arg2: memref<27x256xf32, #tpu.memory_space<vmem>>, %arg3: memref<8x27xbf16, #tpu.memory_space<vmem>>, %arg4: memref<8x1xf32, #tpu.memory_space<vmem>>, %arg5: memref<256x64xbf16, #tpu.memory_space<vmem>>, %arg6: memref<72x64xf32, #tpu.memory_space<vmem>>, %arg7: memref<16x72xbf16, #tpu.memory_space<vmem>>, %arg8: memref<16x1xf32, #tpu.memory_space<vmem>>, %arg9: memref<64x16xbf16, #tpu.memory_space<vmem>>, %arg10: memref<256x64xbf16, #tpu.memory_space<vmem>>, %arg11: memref<1x64xf32, #tpu.memory_space<vmem>>, %arg12: memref<64x64xbf16, #tpu.memory_space<vmem>>, %arg13: memref<1x64xf32, #tpu.memory_space<vmem>>, %arg14: memref<64x10xbf16, #tpu.memory_space<vmem>>, %arg15: memref<1x10xf32, #tpu.memory_space<vmem>>, %arg16: memref<1x1x10xf32, #tpu.memory_space<vmem>>) attributes {dimension_semantics = [#tpu.dimension_semantics<parallel>], iteration_bounds = array<i64: 2>, scalar_prefetch = 0 : i64, scratch_operands = 0 : i64, tpu.core_type = #tpu.core_type<tc>, window_params = [{transform_indices = @transform_0, window_bounds = array<i64: 1, 3, 256>}, {pipeline_mode = #tpu.pipeline_mode<synchronous>, transform_indices = @transform_1, window_bounds = array<i64: 27, 256>}, {pipeline_mode = #tpu.pipeline_mode<synchronous>, transform_indices = @transform_2, window_bounds = array<i64: 8, 27>}, {pipeline_mode = #tpu.pipeline_mode<synchronous>, transform_indices = @transform_3, window_bounds = array<i64: 8, 1>}, {pipeline_mode = #tpu.pipeline_mode<synchronous>, transform_indices = @transform_4, window_bounds = array<i64: 256, 64>}, {pipeline_mode = #tpu.pipeline_mode<synchronous>, transform_indices = @transform_5, window_bounds = array<i64: 72, 64>}, {pipeline_mode = #tpu.pipeline_mode<synchronous>, transform_indices = @transform_6, window_bounds = array<i64: 16, 72>}, {pipeline_mode = #tpu.pipeline_mode<synchronous>, transform_indices = @transform_7, window_bounds = array<i64: 16, 1>}, {pipeline_mode = #tpu.pipeline_mode<synchronous>, transform_indices = @transform_8, window_bounds = array<i64: 64, 16>}, {pipeline_mode = #tpu.pipeline_mode<synchronous>, transform_indices = @transform_9, window_bounds = array<i64: 256, 64>}, {pipeline_mode = #tpu.pipeline_mode<synchronous>, transform_indices = @transform_10, window_bounds = array<i64: 1, 64>}, {pipeline_mode = #tpu.pipeline_mode<synchronous>, transform_indices = @transform_11, window_bounds = array<i64: 64, 64>}, {pipeline_mode = #tpu.pipeline_mode<synchronous>, transform_indices = @transform_12, window_bounds = array<i64: 1, 64>}, {pipeline_mode = #tpu.pipeline_mode<synchronous>, transform_indices = @transform_13, window_bounds = array<i64: 64, 10>}, {pipeline_mode = #tpu.pipeline_mode<synchronous>, transform_indices = @transform_14, window_bounds = array<i64: 1, 10>}, {transform_indices = @transform_15, window_bounds = array<i64: 1, 1, 10>}]} {
    %c0 = arith.constant 0 : index
    %c0_0 = arith.constant 0 : index
    %c0_1 = arith.constant 0 : index
    %0 = vector.load %arg1[%c0, %c0_0, %c0_1] : memref<1x3x256xf32, #tpu.memory_space<vmem>>, vector<1x3x256xf32>
    %1 = vector.shape_cast %0 : vector<1x3x256xf32> to vector<3x256xf32>
    %c0_2 = arith.constant 0 : index
    %c0_3 = arith.constant 0 : index
    %2 = vector.load %arg2[%c0_2, %c0_3] : memref<27x256xf32, #tpu.memory_space<vmem>>, vector<27x256xf32>
    %c0_4 = arith.constant 0 : index
    %c0_5 = arith.constant 0 : index
    %3 = vector.load %arg3[%c0_4, %c0_5] : memref<8x27xbf16, #tpu.memory_space<vmem>>, vector<8x27xbf16>
    %c0_6 = arith.constant 0 : index
    %c0_7 = arith.constant 0 : index
    %4 = vector.load %arg4[%c0_6, %c0_7] : memref<8x1xf32, #tpu.memory_space<vmem>>, vector<8x1xf32>
    %5 = vector.extract_strided_slice %1 {offsets = [0, 239], sizes = [3, 17], strides = [1, 1]} : vector<3x256xf32> to vector<3x17xf32>
    %6 = vector.extract_strided_slice %1 {offsets = [0, 0], sizes = [3, 239], strides = [1, 1]} : vector<3x256xf32> to vector<3x239xf32>
    %7 = tpu.concatenate %5, %6 in 1 : vector<3x17xf32>, vector<3x239xf32> -> vector<3x256xf32>
    %8 = vector.extract_strided_slice %1 {offsets = [0, 240], sizes = [3, 16], strides = [1, 1]} : vector<3x256xf32> to vector<3x16xf32>
    %9 = vector.extract_strided_slice %1 {offsets = [0, 0], sizes = [3, 240], strides = [1, 1]} : vector<3x256xf32> to vector<3x240xf32>
    %10 = tpu.concatenate %8, %9 in 1 : vector<3x16xf32>, vector<3x240xf32> -> vector<3x256xf32>
    %11 = vector.extract_strided_slice %1 {offsets = [0, 241], sizes = [3, 15], strides = [1, 1]} : vector<3x256xf32> to vector<3x15xf32>
    %12 = vector.extract_strided_slice %1 {offsets = [0, 0], sizes = [3, 241], strides = [1, 1]} : vector<3x256xf32> to vector<3x241xf32>
    %13 = tpu.concatenate %11, %12 in 1 : vector<3x15xf32>, vector<3x241xf32> -> vector<3x256xf32>
    %14 = vector.extract_strided_slice %1 {offsets = [0, 255], sizes = [3, 1], strides = [1, 1]} : vector<3x256xf32> to vector<3x1xf32>
    %15 = vector.extract_strided_slice %1 {offsets = [0, 0], sizes = [3, 255], strides = [1, 1]} : vector<3x256xf32> to vector<3x255xf32>
    %16 = tpu.concatenate %14, %15 in 1 : vector<3x1xf32>, vector<3x255xf32> -> vector<3x256xf32>
    %17 = vector.extract_strided_slice %1 {offsets = [0, 1], sizes = [3, 255], strides = [1, 1]} : vector<3x256xf32> to vector<3x255xf32>
    %18 = vector.extract_strided_slice %1 {offsets = [0, 0], sizes = [3, 1], strides = [1, 1]} : vector<3x256xf32> to vector<3x1xf32>
    %19 = tpu.concatenate %17, %18 in 1 : vector<3x255xf32>, vector<3x1xf32> -> vector<3x256xf32>
    %20 = vector.extract_strided_slice %1 {offsets = [0, 15], sizes = [3, 241], strides = [1, 1]} : vector<3x256xf32> to vector<3x241xf32>
    %21 = vector.extract_strided_slice %1 {offsets = [0, 0], sizes = [3, 15], strides = [1, 1]} : vector<3x256xf32> to vector<3x15xf32>
    %22 = tpu.concatenate %20, %21 in 1 : vector<3x241xf32>, vector<3x15xf32> -> vector<3x256xf32>
    %23 = vector.extract_strided_slice %1 {offsets = [0, 16], sizes = [3, 240], strides = [1, 1]} : vector<3x256xf32> to vector<3x240xf32>
    %24 = vector.extract_strided_slice %1 {offsets = [0, 0], sizes = [3, 16], strides = [1, 1]} : vector<3x256xf32> to vector<3x16xf32>
    %25 = tpu.concatenate %23, %24 in 1 : vector<3x240xf32>, vector<3x16xf32> -> vector<3x256xf32>
    %26 = vector.extract_strided_slice %1 {offsets = [0, 17], sizes = [3, 239], strides = [1, 1]} : vector<3x256xf32> to vector<3x239xf32>
    %27 = vector.extract_strided_slice %1 {offsets = [0, 0], sizes = [3, 17], strides = [1, 1]} : vector<3x256xf32> to vector<3x17xf32>
    %28 = tpu.concatenate %26, %27 in 1 : vector<3x239xf32>, vector<3x17xf32> -> vector<3x256xf32>
    %29 = tpu.concatenate %7, %10, %13, %16, %1, %19, %22, %25, %28 in 0 : vector<3x256xf32>, vector<3x256xf32>, vector<3x256xf32>, vector<3x256xf32>, vector<3x256xf32>, vector<3x256xf32>, vector<3x256xf32>, vector<3x256xf32>, vector<3x256xf32> -> vector<27x256xf32>
    %30 = arith.mulf %29, %2 : vector<27x256xf32>
    %31 = arith.truncf %30 : vector<27x256xf32> to vector<27x256xbf16>
    %cst = arith.constant dense<0.000000e+00> : vector<8x256xf32>
    %32 = tpu.matmul %3, %31, %cst {dimension_numbers = #tpu.dot_dimension_numbers<[1], [0], [0], [1], [0, 0, 1, 1], [], []>} : vector<8x27xbf16>, vector<27x256xbf16>, vector<8x256xf32> -> vector<8x256xf32>
    %33 = vector.broadcast %4 : vector<8x1xf32> to vector<8x256xf32>
    %34 = arith.addf %32, %33 : vector<8x256xf32>
    %cst_8 = arith.constant 0.000000e+00 : f32
    %35 = vector.broadcast %cst_8 : f32 to vector<8x256xf32>
    %36 = arith.maximumf %34, %35 : vector<8x256xf32>
    %c0_9 = arith.constant 0 : index
    %c0_10 = arith.constant 0 : index
    %37 = vector.load %arg5[%c0_9, %c0_10] : memref<256x64xbf16, #tpu.memory_space<vmem>>, vector<256x64xbf16>
    %38 = vector.extract_strided_slice %36 {offsets = [0, 1], sizes = [8, 255], strides = [1, 1]} : vector<8x256xf32> to vector<8x255xf32>
    %39 = vector.extract_strided_slice %36 {offsets = [0, 0], sizes = [8, 1], strides = [1, 1]} : vector<8x256xf32> to vector<8x1xf32>
    %40 = tpu.concatenate %38, %39 in 1 : vector<8x255xf32>, vector<8x1xf32> -> vector<8x256xf32>
    %41 = arith.maximumf %36, %40 : vector<8x256xf32>
    %42 = vector.extract_strided_slice %41 {offsets = [0, 16], sizes = [8, 240], strides = [1, 1]} : vector<8x256xf32> to vector<8x240xf32>
    %43 = vector.extract_strided_slice %41 {offsets = [0, 0], sizes = [8, 16], strides = [1, 1]} : vector<8x256xf32> to vector<8x16xf32>
    %44 = tpu.concatenate %42, %43 in 1 : vector<8x240xf32>, vector<8x16xf32> -> vector<8x256xf32>
    %45 = arith.maximumf %41, %44 : vector<8x256xf32>
    %46 = arith.truncf %45 : vector<8x256xf32> to vector<8x256xbf16>
    %cst_11 = arith.constant dense<0.000000e+00> : vector<8x64xf32>
    %47 = tpu.matmul %46, %37, %cst_11 {dimension_numbers = #tpu.dot_dimension_numbers<[1], [0], [0], [1], [0, 0, 1, 1], [], []>} : vector<8x256xbf16>, vector<256x64xbf16>, vector<8x64xf32> -> vector<8x64xf32>
    %c0_12 = arith.constant 0 : index
    %c0_13 = arith.constant 0 : index
    %48 = vector.load %arg6[%c0_12, %c0_13] : memref<72x64xf32, #tpu.memory_space<vmem>>, vector<72x64xf32>
    %c0_14 = arith.constant 0 : index
    %c0_15 = arith.constant 0 : index
    %49 = vector.load %arg7[%c0_14, %c0_15] : memref<16x72xbf16, #tpu.memory_space<vmem>>, vector<16x72xbf16>
    %c0_16 = arith.constant 0 : index
    %c0_17 = arith.constant 0 : index
    %50 = vector.load %arg8[%c0_16, %c0_17] : memref<16x1xf32, #tpu.memory_space<vmem>>, vector<16x1xf32>
    %51 = vector.extract_strided_slice %47 {offsets = [0, 55], sizes = [8, 9], strides = [1, 1]} : vector<8x64xf32> to vector<8x9xf32>
    %52 = vector.extract_strided_slice %47 {offsets = [0, 0], sizes = [8, 55], strides = [1, 1]} : vector<8x64xf32> to vector<8x55xf32>
    %53 = tpu.concatenate %51, %52 in 1 : vector<8x9xf32>, vector<8x55xf32> -> vector<8x64xf32>
    %54 = vector.extract_strided_slice %47 {offsets = [0, 56], sizes = [8, 8], strides = [1, 1]} : vector<8x64xf32> to vector<8x8xf32>
    %55 = vector.extract_strided_slice %47 {offsets = [0, 0], sizes = [8, 56], strides = [1, 1]} : vector<8x64xf32> to vector<8x56xf32>
    %56 = tpu.concatenate %54, %55 in 1 : vector<8x8xf32>, vector<8x56xf32> -> vector<8x64xf32>
    %57 = vector.extract_strided_slice %47 {offsets = [0, 57], sizes = [8, 7], strides = [1, 1]} : vector<8x64xf32> to vector<8x7xf32>
    %58 = vector.extract_strided_slice %47 {offsets = [0, 0], sizes = [8, 57], strides = [1, 1]} : vector<8x64xf32> to vector<8x57xf32>
    %59 = tpu.concatenate %57, %58 in 1 : vector<8x7xf32>, vector<8x57xf32> -> vector<8x64xf32>
    %60 = vector.extract_strided_slice %47 {offsets = [0, 63], sizes = [8, 1], strides = [1, 1]} : vector<8x64xf32> to vector<8x1xf32>
    %61 = vector.extract_strided_slice %47 {offsets = [0, 0], sizes = [8, 63], strides = [1, 1]} : vector<8x64xf32> to vector<8x63xf32>
    %62 = tpu.concatenate %60, %61 in 1 : vector<8x1xf32>, vector<8x63xf32> -> vector<8x64xf32>
    %63 = vector.extract_strided_slice %47 {offsets = [0, 1], sizes = [8, 63], strides = [1, 1]} : vector<8x64xf32> to vector<8x63xf32>
    %64 = vector.extract_strided_slice %47 {offsets = [0, 0], sizes = [8, 1], strides = [1, 1]} : vector<8x64xf32> to vector<8x1xf32>
    %65 = tpu.concatenate %63, %64 in 1 : vector<8x63xf32>, vector<8x1xf32> -> vector<8x64xf32>
    %66 = vector.extract_strided_slice %47 {offsets = [0, 7], sizes = [8, 57], strides = [1, 1]} : vector<8x64xf32> to vector<8x57xf32>
    %67 = vector.extract_strided_slice %47 {offsets = [0, 0], sizes = [8, 7], strides = [1, 1]} : vector<8x64xf32> to vector<8x7xf32>
    %68 = tpu.concatenate %66, %67 in 1 : vector<8x57xf32>, vector<8x7xf32> -> vector<8x64xf32>
    %69 = vector.extract_strided_slice %47 {offsets = [0, 8], sizes = [8, 56], strides = [1, 1]} : vector<8x64xf32> to vector<8x56xf32>
    %70 = vector.extract_strided_slice %47 {offsets = [0, 0], sizes = [8, 8], strides = [1, 1]} : vector<8x64xf32> to vector<8x8xf32>
    %71 = tpu.concatenate %69, %70 in 1 : vector<8x56xf32>, vector<8x8xf32> -> vector<8x64xf32>
    %72 = vector.extract_strided_slice %47 {offsets = [0, 9], sizes = [8, 55], strides = [1, 1]} : vector<8x64xf32> to vector<8x55xf32>
    %73 = vector.extract_strided_slice %47 {offsets = [0, 0], sizes = [8, 9], strides = [1, 1]} : vector<8x64xf32> to vector<8x9xf32>
    %74 = tpu.concatenate %72, %73 in 1 : vector<8x55xf32>, vector<8x9xf32> -> vector<8x64xf32>
    %75 = tpu.concatenate %53, %56, %59, %62, %47, %65, %68, %71, %74 in 0 : vector<8x64xf32>, vector<8x64xf32>, vector<8x64xf32>, vector<8x64xf32>, vector<8x64xf32>, vector<8x64xf32>, vector<8x64xf32>, vector<8x64xf32>, vector<8x64xf32> -> vector<72x64xf32>
    %76 = arith.mulf %75, %48 : vector<72x64xf32>
    %77 = arith.truncf %76 : vector<72x64xf32> to vector<72x64xbf16>
    %cst_18 = arith.constant dense<0.000000e+00> : vector<16x64xf32>
    %78 = tpu.matmul %49, %77, %cst_18 {dimension_numbers = #tpu.dot_dimension_numbers<[1], [0], [0], [1], [0, 0, 1, 1], [], []>} : vector<16x72xbf16>, vector<72x64xbf16>, vector<16x64xf32> -> vector<16x64xf32>
    %79 = vector.broadcast %50 : vector<16x1xf32> to vector<16x64xf32>
    %80 = arith.addf %78, %79 : vector<16x64xf32>
    %cst_19 = arith.constant 0.000000e+00 : f32
    %81 = vector.broadcast %cst_19 : f32 to vector<16x64xf32>
    %82 = arith.maximumf %80, %81 : vector<16x64xf32>
    %c0_20 = arith.constant 0 : index
    %c0_21 = arith.constant 0 : index
    %83 = vector.load %arg9[%c0_20, %c0_21] : memref<64x16xbf16, #tpu.memory_space<vmem>>, vector<64x16xbf16>
    %84 = vector.extract_strided_slice %82 {offsets = [0, 1], sizes = [16, 63], strides = [1, 1]} : vector<16x64xf32> to vector<16x63xf32>
    %85 = vector.extract_strided_slice %82 {offsets = [0, 0], sizes = [16, 1], strides = [1, 1]} : vector<16x64xf32> to vector<16x1xf32>
    %86 = tpu.concatenate %84, %85 in 1 : vector<16x63xf32>, vector<16x1xf32> -> vector<16x64xf32>
    %87 = arith.maximumf %82, %86 : vector<16x64xf32>
    %88 = vector.extract_strided_slice %87 {offsets = [0, 8], sizes = [16, 56], strides = [1, 1]} : vector<16x64xf32> to vector<16x56xf32>
    %89 = vector.extract_strided_slice %87 {offsets = [0, 0], sizes = [16, 8], strides = [1, 1]} : vector<16x64xf32> to vector<16x8xf32>
    %90 = tpu.concatenate %88, %89 in 1 : vector<16x56xf32>, vector<16x8xf32> -> vector<16x64xf32>
    %91 = arith.maximumf %87, %90 : vector<16x64xf32>
    %92 = arith.truncf %91 : vector<16x64xf32> to vector<16x64xbf16>
    %cst_22 = arith.constant dense<0.000000e+00> : vector<16x16xf32>
    %93 = tpu.matmul %92, %83, %cst_22 {dimension_numbers = #tpu.dot_dimension_numbers<[1], [0], [0], [1], [0, 0, 1, 1], [], []>} : vector<16x64xbf16>, vector<64x16xbf16>, vector<16x16xf32> -> vector<16x16xf32>
    %94 = vector.extract_strided_slice %93 {offsets = [0, 0], sizes = [1, 16], strides = [1, 1]} : vector<16x16xf32> to vector<1x16xf32>
    %95 = vector.extract_strided_slice %93 {offsets = [1, 0], sizes = [1, 16], strides = [1, 1]} : vector<16x16xf32> to vector<1x16xf32>
    %96 = vector.extract_strided_slice %93 {offsets = [2, 0], sizes = [1, 16], strides = [1, 1]} : vector<16x16xf32> to vector<1x16xf32>
    %97 = vector.extract_strided_slice %93 {offsets = [3, 0], sizes = [1, 16], strides = [1, 1]} : vector<16x16xf32> to vector<1x16xf32>
    %98 = vector.extract_strided_slice %93 {offsets = [4, 0], sizes = [1, 16], strides = [1, 1]} : vector<16x16xf32> to vector<1x16xf32>
    %99 = vector.extract_strided_slice %93 {offsets = [5, 0], sizes = [1, 16], strides = [1, 1]} : vector<16x16xf32> to vector<1x16xf32>
    %100 = vector.extract_strided_slice %93 {offsets = [6, 0], sizes = [1, 16], strides = [1, 1]} : vector<16x16xf32> to vector<1x16xf32>
    %101 = vector.extract_strided_slice %93 {offsets = [7, 0], sizes = [1, 16], strides = [1, 1]} : vector<16x16xf32> to vector<1x16xf32>
    %102 = vector.extract_strided_slice %93 {offsets = [8, 0], sizes = [1, 16], strides = [1, 1]} : vector<16x16xf32> to vector<1x16xf32>
    %103 = vector.extract_strided_slice %93 {offsets = [9, 0], sizes = [1, 16], strides = [1, 1]} : vector<16x16xf32> to vector<1x16xf32>
    %104 = vector.extract_strided_slice %93 {offsets = [10, 0], sizes = [1, 16], strides = [1, 1]} : vector<16x16xf32> to vector<1x16xf32>
    %105 = vector.extract_strided_slice %93 {offsets = [11, 0], sizes = [1, 16], strides = [1, 1]} : vector<16x16xf32> to vector<1x16xf32>
    %106 = vector.extract_strided_slice %93 {offsets = [12, 0], sizes = [1, 16], strides = [1, 1]} : vector<16x16xf32> to vector<1x16xf32>
    %107 = vector.extract_strided_slice %93 {offsets = [13, 0], sizes = [1, 16], strides = [1, 1]} : vector<16x16xf32> to vector<1x16xf32>
    %108 = vector.extract_strided_slice %93 {offsets = [14, 0], sizes = [1, 16], strides = [1, 1]} : vector<16x16xf32> to vector<1x16xf32>
    %109 = vector.extract_strided_slice %93 {offsets = [15, 0], sizes = [1, 16], strides = [1, 1]} : vector<16x16xf32> to vector<1x16xf32>
    %110 = tpu.concatenate %94, %95, %96, %97, %98, %99, %100, %101, %102, %103, %104, %105, %106, %107, %108, %109 in 1 : vector<1x16xf32>, vector<1x16xf32>, vector<1x16xf32>, vector<1x16xf32>, vector<1x16xf32>, vector<1x16xf32>, vector<1x16xf32>, vector<1x16xf32>, vector<1x16xf32>, vector<1x16xf32>, vector<1x16xf32>, vector<1x16xf32>, vector<1x16xf32>, vector<1x16xf32>, vector<1x16xf32>, vector<1x16xf32> -> vector<1x256xf32>
    %111 = arith.truncf %110 : vector<1x256xf32> to vector<1x256xbf16>
    %c0_23 = arith.constant 0 : index
    %c0_24 = arith.constant 0 : index
    %112 = vector.load %arg10[%c0_23, %c0_24] : memref<256x64xbf16, #tpu.memory_space<vmem>>, vector<256x64xbf16>
    %cst_25 = arith.constant dense<0.000000e+00> : vector<1x64xf32>
    %113 = tpu.matmul %111, %112, %cst_25 {dimension_numbers = #tpu.dot_dimension_numbers<[1], [0], [0], [1], [0, 0, 1, 1], [], []>} : vector<1x256xbf16>, vector<256x64xbf16>, vector<1x64xf32> -> vector<1x64xf32>
    %c0_26 = arith.constant 0 : index
    %c0_27 = arith.constant 0 : index
    %114 = vector.load %arg11[%c0_26, %c0_27] : memref<1x64xf32, #tpu.memory_space<vmem>>, vector<1x64xf32>
    %115 = arith.addf %113, %114 : vector<1x64xf32>
    %cst_28 = arith.constant 0.000000e+00 : f32
    %116 = vector.broadcast %cst_28 : f32 to vector<1x64xf32>
    %117 = arith.maximumf %115, %116 : vector<1x64xf32>
    %118 = arith.truncf %117 : vector<1x64xf32> to vector<1x64xbf16>
    %c0_29 = arith.constant 0 : index
    %c0_30 = arith.constant 0 : index
    %119 = vector.load %arg12[%c0_29, %c0_30] : memref<64x64xbf16, #tpu.memory_space<vmem>>, vector<64x64xbf16>
    %cst_31 = arith.constant dense<0.000000e+00> : vector<1x64xf32>
    %120 = tpu.matmul %118, %119, %cst_31 {dimension_numbers = #tpu.dot_dimension_numbers<[1], [0], [0], [1], [0, 0, 1, 1], [], []>} : vector<1x64xbf16>, vector<64x64xbf16>, vector<1x64xf32> -> vector<1x64xf32>
    %c0_32 = arith.constant 0 : index
    %c0_33 = arith.constant 0 : index
    %121 = vector.load %arg13[%c0_32, %c0_33] : memref<1x64xf32, #tpu.memory_space<vmem>>, vector<1x64xf32>
    %122 = arith.addf %120, %121 : vector<1x64xf32>
    %cst_34 = arith.constant 0.000000e+00 : f32
    %123 = vector.broadcast %cst_34 : f32 to vector<1x64xf32>
    %124 = arith.maximumf %122, %123 : vector<1x64xf32>
    %125 = arith.truncf %124 : vector<1x64xf32> to vector<1x64xbf16>
    %c0_35 = arith.constant 0 : index
    %c0_36 = arith.constant 0 : index
    %126 = vector.load %arg14[%c0_35, %c0_36] : memref<64x10xbf16, #tpu.memory_space<vmem>>, vector<64x10xbf16>
    %cst_37 = arith.constant dense<0.000000e+00> : vector<1x10xf32>
    %127 = tpu.matmul %125, %126, %cst_37 {dimension_numbers = #tpu.dot_dimension_numbers<[1], [0], [0], [1], [0, 0, 1, 1], [], []>} : vector<1x64xbf16>, vector<64x10xbf16>, vector<1x10xf32> -> vector<1x10xf32>
    %c0_38 = arith.constant 0 : index
    %c0_39 = arith.constant 0 : index
    %128 = vector.load %arg15[%c0_38, %c0_39] : memref<1x10xf32, #tpu.memory_space<vmem>>, vector<1x10xf32>
    %129 = arith.addf %127, %128 : vector<1x10xf32>
    %c0_40 = arith.constant 0 : index
    %c0_41 = arith.constant 0 : index
    %c0_42 = arith.constant 0 : index
    %130 = vector.load %arg16[%c0_40, %c0_41, %c0_42] : memref<1x1x10xf32, #tpu.memory_space<vmem>>, vector<1x1x10xf32>
    %131 = vector.shape_cast %130 : vector<1x1x10xf32> to vector<1x10xf32>
    %132 = vector.shape_cast %129 : vector<1x10xf32> to vector<1x1x10xf32>
    tpu.vector_store %arg16[%c0_40, %c0_41, %c0_42], %132 {strides = array<i32>} : memref<1x1x10xf32, #tpu.memory_space<vmem>>, vector<1x1x10xf32>,
    return
  }
  func.func @transform_0(%arg0: i32) -> (i32, i32, i32) {
    %c0_i32 = arith.constant 0 : i32
    %c0_i32_0 = arith.constant 0 : i32
    %c0_i32_1 = arith.constant 0 : i32
    return %arg0, %c0_i32, %c0_i32_0 : i32, i32, i32
  }
  func.func @transform_1(%arg0: i32) -> (i32, i32) {
    %c0_i32 = arith.constant 0 : i32
    %c0_i32_0 = arith.constant 0 : i32
    %c0_i32_1 = arith.constant 0 : i32
    return %c0_i32, %c0_i32_0 : i32, i32
  }
  func.func @transform_2(%arg0: i32) -> (i32, i32) {
    %c0_i32 = arith.constant 0 : i32
    %c0_i32_0 = arith.constant 0 : i32
    %c0_i32_1 = arith.constant 0 : i32
    return %c0_i32, %c0_i32_0 : i32, i32
  }
  func.func @transform_3(%arg0: i32) -> (i32, i32) {
    %c0_i32 = arith.constant 0 : i32
    %c0_i32_0 = arith.constant 0 : i32
    %c0_i32_1 = arith.constant 0 : i32
    return %c0_i32, %c0_i32_0 : i32, i32
  }
  func.func @transform_4(%arg0: i32) -> (i32, i32) {
    %c0_i32 = arith.constant 0 : i32
    %c0_i32_0 = arith.constant 0 : i32
    %c0_i32_1 = arith.constant 0 : i32
    return %c0_i32, %c0_i32_0 : i32, i32
  }
  func.func @transform_5(%arg0: i32) -> (i32, i32) {
    %c0_i32 = arith.constant 0 : i32
    %c0_i32_0 = arith.constant 0 : i32
    %c0_i32_1 = arith.constant 0 : i32
    return %c0_i32, %c0_i32_0 : i32, i32
  }
  func.func @transform_6(%arg0: i32) -> (i32, i32) {
    %c0_i32 = arith.constant 0 : i32
    %c0_i32_0 = arith.constant 0 : i32
    %c0_i32_1 = arith.constant 0 : i32
    return %c0_i32, %c0_i32_0 : i32, i32
  }
  func.func @transform_7(%arg0: i32) -> (i32, i32) {
    %c0_i32 = arith.constant 0 : i32
    %c0_i32_0 = arith.constant 0 : i32
    %c0_i32_1 = arith.constant 0 : i32
    return %c0_i32, %c0_i32_0 : i32, i32
  }
  func.func @transform_8(%arg0: i32) -> (i32, i32) {
    %c0_i32 = arith.constant 0 : i32
    %c0_i32_0 = arith.constant 0 : i32
    %c0_i32_1 = arith.constant 0 : i32
    return %c0_i32, %c0_i32_0 : i32, i32
  }
  func.func @transform_9(%arg0: i32) -> (i32, i32) {
    %c0_i32 = arith.constant 0 : i32
    %c0_i32_0 = arith.constant 0 : i32
    %c0_i32_1 = arith.constant 0 : i32
    return %c0_i32, %c0_i32_0 : i32, i32
  }
  func.func @transform_10(%arg0: i32) -> (i32, i32) {
    %c0_i32 = arith.constant 0 : i32
    %c0_i32_0 = arith.constant 0 : i32
    %c0_i32_1 = arith.constant 0 : i32
    return %c0_i32, %c0_i32_0 : i32, i32
  }
  func.func @transform_11(%arg0: i32) -> (i32, i32) {
    %c0_i32 = arith.constant 0 : i32
    %c0_i32_0 = arith.constant 0 : i32
    %c0_i32_1 = arith.constant 0 : i32
    return %c0_i32, %c0_i32_0 : i32, i32
  }
  func.func @transform_12(%arg0: i32) -> (i32, i32) {
    %c0_i32 = arith.constant 0 : i32
    %c0_i32_0 = arith.constant 0 : i32
    %c0_i32_1 = arith.constant 0 : i32
    return %c0_i32, %c0_i32_0 : i32, i32
  }
  func.func @transform_13(%arg0: i32) -> (i32, i32) {
    %c0_i32 = arith.constant 0 : i32
    %c0_i32_0 = arith.constant 0 : i32
    %c0_i32_1 = arith.constant 0 : i32
    return %c0_i32, %c0_i32_0 : i32, i32
  }
  func.func @transform_14(%arg0: i32) -> (i32, i32) {
    %c0_i32 = arith.constant 0 : i32
    %c0_i32_0 = arith.constant 0 : i32
    %c0_i32_1 = arith.constant 0 : i32
    return %c0_i32, %c0_i32_0 : i32, i32
  }
  func.func @transform_15(%arg0: i32) -> (i32, i32, i32) {
    %c0_i32 = arith.constant 0 : i32
    %c0_i32_0 = arith.constant 0 : i32
    %c0_i32_1 = arith.constant 0 : i32
    return %arg0, %c0_i32, %c0_i32_0 : i32, i32, i32
  }
}

</mosaic_0001>

<bundles_post_ra>
// kernel: vgg_forward.1
= control target key start
LH: loop header
LB: loop body
LE: loop exit
PB: predicated region body
PF: predicated region fallthrough
CT: control target
= control target key end

     0   :  { %s2607_s0 = inlined_call_operand.vmem [shape: f32[2,3,256], index: 0, kind: input, shape index: {}]   ;;  %s2608_s1 = inlined_call_operand.vmem [shape: f32[27,256], index: 1, kind: input, shape index: {}]   ;;  %s2609_s2 = inlined_call_operand.vmem [shape: bf16[8,27], index: 2, kind: input, shape index: {}]   ;;  %s2610_s3 = inlined_call_operand.vmem [shape: f32[8,1], index: 3, kind: input, shape index: {}]   ;;  %s2611_s4 = inlined_call_operand.vmem [shape: bf16[256,64], index: 4, kind: input, shape index: {}]   ;;  %s2612_s5 = inlined_call_operand.vmem [shape: f32[72,64], index: 5, kind: input, shape index: {}]   ;;  %s2613_s6 = inlined_call_operand.vmem [shape: bf16[16,72], index: 6, kind: input, shape index: {}]   ;;  %s2614_s7 = inlined_call_operand.vmem [shape: f32[16,1], index: 7, kind: input, shape index: {}]   ;;  %s2615_s8 = inlined_call_operand.vmem [shape: bf16[64,16], index: 8, kind: input, shape index: {}]   ;;  %s2616_s9 = inlined_call_operand.vmem [shape: bf16[256,64], index: 9, kind: input, shape index: {}]   ;;  %s2617_s10 = inlined_call_operand.vmem [shape: f32[1,64], index: 10, kind: input, shape index: {}]   ;;  %s2618_s11 = inlined_call_operand.vmem [shape: bf16[64,64], index: 11, kind: input, shape index: {}]   ;;  %s2619_s12 = inlined_call_operand.vmem [shape: f32[1,64], index: 12, kind: input, shape index: {}]   ;;  %s2620_s13 = inlined_call_operand.vmem [shape: bf16[64,10], index: 13, kind: input, shape index: {}]   ;;  %s2621_s14 = inlined_call_operand.vmem [shape: f32[1,10], index: 14, kind: input, shape index: {}]   ;;  %s2622_s15 = inlined_call_operand.hbm [shape: f32[2,1,10], index: 15, kind: output, shape index: {}]  }
   0x1   :  { %2632 = sst [smem:[#allocation7_spill]] %s2607_s0 }
   0x2   :  { %2633 = sst [smem:[#allocation8_spill]] %s2608_s1 }
   0x3   :  { %2634 = sst [smem:[#allocation9_spill]] %s2609_s2 }
   0x4   :  { %20 = vsyncpa [#allocation3], 0 }
   0x5   :  { %22 = vsyncpa [#allocation3 + $0x1], 0  ;;  %s2179_s18 = smov 0   ;;  %s2181_s19 = smov 0  }
   0x6   :  { %s2183_s20 = smov 0   ;;  %s2185_s21 = smov 0  }
   0x7 LB: > { %2635 = sst [smem:[#allocation5_spill]] %s2061_s20  ;;  %s2200_s22 = sadd.s32 4294967295, %s2065_s21   ;;  %s2065_s21 = sphi %s2185_s21, %s2652_s21   ;;  %s2061_s20 = sphi %s2183_s20, %s2649_s20   ;;  %s2057_s19 = sphi %s2181_s19, %s2651_s19   ;;  %s2053_s18 = sphi %s2179_s18, %s2650_s18  }
   0x8   : > { %s1644_s23 = sadd.s32 4294967294, %s2065_s21   ;;  %s2204_s24 = sadd.s32 1, %s2065_s21  }
   0x9   : > { %s355_s25 = sadd.s32 1, %s2061_s20  ;;  %s352_s26 = ssub.s32 %s2065_s21, %s2204_s24 }
   0xa   : > { %p365_p0 = scmp.ne.s32.totalorder %s2061_s20, %s2057_s19  ;;  %p353_p1 = scmp.eq.s32.totalorder %s352_s26, 0 }
   0xb   : > { %p366_p2 = scmp.eq.s32.totalorder %s2200_s22, 1  ;;  %p371_p3 = scmp.ne.s32.totalorder %s2057_s19, %s2053_s18 }
   0xc   : > { %p372_p4 = scmp.eq.s32.totalorder %s1644_s23, 1  ;;  %p1647_p7 = scmp.ge.s32.totalorder %s2065_s21, 1 }
   0xd   : > { %s2215_s27 = scalar_select %p353_p1, %s2061_s20, %s355_s25  }
   0xe   : > { %p2217_p5 = por %p366_p2, %p365_p0  ;;  %p2221_p6 = por %p372_p4, %p371_p3 }
   0xf   : > { %2636 = sst [smem:[#allocation6_spill]] %s2215_s27  ;;  %p440_p8 = scmp.lt.s32.totalorder %s2065_s21, 3 }
  0x11   : > { %p441_p9 = pnand %p1647_p7, %p440_p8 }
  0x12   : > { %p487_p10 = scmp.lt.s32.totalorder (!%p441_p9), %s2200_s22, 1  ;;  %s2639_s0 = sld [smem:[#allocation7_spill]] (!%p441_p9)  ;;  %v2074_v2 = vmov (!%p441_p9), 0   ;;  %v503_v3 = vld [vmem:[%s2610_s3] sm:$0xff] (!%p441_p9)  ;;  %vm530_vm0 = vcmask (!%p441_p9), 121856   ;;  %vm539_vm1 = vcmask (!%p441_p9), 7168  }
  0x13   : > { %444 = sbr.rel (%p441_p9) target bundleno = 2498 (0x9c2), region = 80  ;;  %s2625_s26 = smov (!%p441_p9), 1   ;;  %694 = vmatprep.mubr.bf16.mxu1 (!%p441_p9), %v2074_v2  ;;  %1889 = vset.pattern.permute.xlu0 (!%p441_p9), %v2074_v2  ;;  %vm521_vm2 = vcmask (!%p441_p9), 130048   ;;  %vm618_vm3 = vcmask (!%p441_p9), 1040384   ;;  %vm547_vm4 = vcmask (!%p441_p9), 1039360   ;;  %vm621_vm5 = vcmask (!%p441_p9), 1043456  }
  0x14   : > { %s2068_s27 = smov (!%p441_p9), 15   ;;  %s2624_s20 = smov (!%p441_p9), 16   ;;  %1900 = vset.pattern.permute.xlu1 (!%p441_p9), %v2074_v2  ;;  %vm511_vm6 = vcmask (!%p441_p9), 138240   ;;  %vm624_vm7 = vcmask (!%p441_p9), 1046528   ;;  %vm612_vm8 = vcmask (!%p441_p9), 1042432   ;;  %vm615_vm9 = vcmask (!%p441_p9), 1045504  }
  0x15   : > { %s2072_s17 = smov (!%p441_p9), 113   ;;  %s2626_s23 = smov (!%p441_p9), 112   ;;  %vm556_vm10 = vcmask (!%p441_p9), 924672   ;;  %vm565_vm11 = vcmask (!%p441_p9), 916480   ;;  %vm627_vm12 = vcmask (!%p441_p9), 1041408   ;;  %vm630_vm13 = vcmask (!%p441_p9), 1044480  }
  0x16   : > { %s2640_s1 = sld [smem:[#allocation8_spill]] (!%p441_p9)  ;;  %vm574_vm14 = vcmask (!%p441_p9), 908288   ;;  %s2641_s2 = sld [smem:[#allocation9_spill]] (!%p441_p9)  ;;  %vm650_vm15 = vcmask (!%p441_p9), 220160  }
  0x1a   : > { %s488_s30 = scalar_select %p487_p10, %s2200_s22, 1 }
  0x1c   : > { %s1703_s16 = sshll.u32 %s488_s30, 3  ;;  %s2628_s30 = smov 127   ;;  %v497_v33 = vld [vmem:[%s2640_s1 + $0x18] sm:$0xff]  ;;  %v495_v38 = vld [vmem:[%s2640_s1 + $0x8] sm:$0xff]  ;;  %v494_v40 = vld [vmem:[%s2640_s1] sm:$0xff] }
  0x1d   : > { %s491_s25 = scalar_lea.vmem %s2639_s0, %s1703_s16  ;;  %s2071_s16 = smov 17   ;;  %v496_v41 = vld [vmem:[%s2640_s1 + $0x10] sm:$0xff]  ;;  %v499_v2 = vld [vmem:[%s2640_s1 + $0x28] sm:$0xff] }
  0x1e   : > { %v2232_v0 = vld [vmem:[%s491_s25] sm:$0x77]  ;;  %s2643_s0 = smov 112   ;;  %s2085_s25 = smov 63  }
  0x1f   : > { %537 = vrot.lane.b32.xlu1 %v2232_v0, %s2625_s26  ;;  %528 = vrot.lane.b32.xlu0 %v2232_v0, %s2068_s27  ;;  %v505_v1 = vcombine.high %v2232_v0, %v2232_v0  ;;  %v595_v22 = vcombine.low %v2232_v0, %v2232_v0 }
  0x23   : > { %519 = vrot.lane.b32.xlu1 %v2232_v0, %s2624_s20  ;;  %525 = vrot.lane.b32.xlu0 %v505_v1, %s2068_s27  ;;  %s2084_s27 = smov 65  }
  0x27   : > { %534 = vrot.lane.b32.xlu1 %v505_v1, %s2625_s26  ;;  %516 = vrot.lane.b32.xlu0 %v505_v1, %s2624_s20  ;;  %s2075_s20 = smov 111   ;;  %s2080_s26 = smov 8  }
  0x2b   : > { %545 = vrot.lane.b32.xlu1 %v505_v1, %s2628_s30  ;;  %543 = vrot.lane.b32.xlu0 %v2232_v0, %s2628_s30  ;;  %s2079_s30 = smov 73  }
  0x2f   : > { %509 = vrot.lane.b32.xlu1 %v2232_v0, %s2071_s16  ;;  %506 = vrot.lane.b32.xlu0 %v505_v1, %s2071_s16  ;;  %s2082_s16 = smov 7  }
  0x33   : > { %554 = vrot.lane.b32.xlu1 %v505_v1, %s2072_s17  ;;  %552 = vrot.lane.b32.xlu0 %v2232_v0, %s2072_s17  ;;  %s2642_s17 = smov 127  }
  0x37   : > { %563 = vrot.lane.b32.xlu1 %v505_v1, %s2626_s23  ;;  %561 = vrot.lane.b32.xlu0 %v2232_v0, %s2626_s23  ;;  %s2081_s23 = smov 72  }
  0x3b   : > { %572 = vrot.lane.b32.xlu1 %v505_v1, %s2075_s20  ;;  %570 = vrot.lane.b32.xlu0 %v2232_v0, %s2075_s20  ;;  %v498_v1 = vld [vmem:[%s2640_s1 + $0x20] sm:$0xff]  ;;  %s2078_s20 = smov 9  }
  0x3f   : > { %647 = vperm.xlu0 %1889, %v503_v3  }
  0x91   : > { %v538_v4 = vpop.permute.xlu1 %537  ;;  %v529_v5 = vpop.permute.xlu0 %528 }
  0x95   : > { %v520_v6 = vpop.permute.xlu1 %519  ;;  %v526_v7 = vpop.permute.xlu0 %525 }
  0x96   : > { %v531_v8 = vsel %vm530_vm0, %v529_v5, %v526_v7  ;;  %v533_v9 = vsel %vm530_vm0, %v526_v7, %v529_v5  ;;  %v500_v5 = vld [vmem:[%s2640_s1 + $0x30] sm:$0x7]  ;;  %vm2088_vm0 = vmmov 0  }
  0x97   : > { %v586_v16 = vrot.slane %v533_v9, 2  ;;  %v587_v17 = vrot.slane %v531_v8, 2 }
  0x99   : > { %v535_v10 = vpop.permute.xlu1 %534  ;;  %v517_v11 = vpop.permute.xlu0 %516 }
  0x9a   : > { %v540_v12 = vsel %vm539_vm1, %v538_v4, %v535_v10  ;;  %v542_v13 = vsel %vm539_vm1, %v535_v10, %v538_v4  ;;  %v522_v18 = vsel %vm521_vm2, %v520_v6, %v517_v11  ;;  %v524_v19 = vsel %vm521_vm2, %v517_v11, %v520_v6  ;;  %v501_v6 = vld [vmem:[%s2640_s1 + $0x38] sm:$0x7]  ;;  %s2083_s1 = smov 71  }
  0x9b   : > { %v591_v14 = vrot.slane %v542_v13, 7  ;;  %v592_v15 = vrot.slane %v540_v12, 7  ;;  %v581_v29 = vrot.slane %v524_v19, 5  ;;  %v582_v30 = vrot.slane %v522_v18, 5 }
  0x9c   : > { %v2076_v11 = vmov 65535  }
  0x9d   : > { %v546_v20 = vpop.permute.xlu1 %545  ;;  %v544_v21 = vpop.permute.xlu0 %543  ;;  %v619_v23 = vsel %vm618_vm3, %v586_v16, %v591_v14  ;;  %v620_v24 = vsel %vm618_vm3, %v587_v17, %v592_v15  ;;  %v654_v12 = vsel %vm630_vm13, 4294967295, %v2076_v11  ;;  %v913_v11 = vld [vmem:[%s2614_s7 + $0x8] sm:$0xff]  ;;  %vm921_vm3 = vcmask 72704  }
  0x9e   : > { %v548_v25 = vsel %vm547_vm4, %v544_v21, %v546_v20  ;;  %v551_v26 = vsel %vm547_vm4, %v546_v20, %v544_v21  ;;  %v623_v34 = vsel %vm621_vm5, %v620_v24, %v2232_v0  ;;  %v622_v35 = vsel %vm621_vm5, %v619_v23, %v595_v22  ;;  %v502_v24 = vld [vmem:[%s2641_s2] sm:$0xf]  ;;  %s2644_s2 = smov 1  }
  0x9f   : > { %v598_v27 = vrot.slane %v548_v25, 1  ;;  %v599_v28 = vrot.slane %v551_v26, 1  ;;  %v655_v19 = vsel %vm615_vm9, %v654_v12, 0 }
  0xa1   : > { %v510_v31 = vpop.permute.xlu1 %509  ;;  %v507_v32 = vpop.permute.xlu0 %506  ;;  %v626_v39 = vsel %vm624_vm7, %v623_v34, %v599_v28  ;;  %v625_v42 = vsel %vm624_vm7, %v622_v35, %v598_v27  ;;  %vm952_vm7 = vcmask 515072  }
  0xa2   : > { %v512_v36 = vsel %vm511_vm6, %v510_v31, %v507_v32  ;;  %v515_v37 = vsel %vm511_vm6, %v507_v32, %v510_v31  ;;  %v636_v50 = vmul.f32 %v626_v39, %v497_v33  ;;  %v635_v52 = vmul.f32 %v625_v42, %v496_v41  ;;  %v1958_v31 = vld [vmem:[%s2611_s4 + $0x40] sm:$0xff]   ;;  %v1960_v33 = vld [vmem:[%s2611_s4 + $0x48] sm:$0xff]   ;;  %v1962_v39 = vld [vmem:[%s2611_s4 + $0x50] sm:$0xff]  }
  0xa3   : > { %v613_v43 = vsel %vm612_vm8, %v515_v37, %v581_v29  ;;  %v614_v44 = vsel %vm612_vm8, %v512_v36, %v582_v30  ;;  %v1959_v32 = vld [vmem:[%s2611_s4] sm:$0xff]   ;;  %v1961_v37 = vld [vmem:[%s2611_s4 + $0x8] sm:$0xff]   ;;  %v1964_v41 = vld [vmem:[%s2611_s4 + $0x58] sm:$0xff]   ;;  %vm937_vm6 = vcmask 56320   ;;  %vm968_vm8 = vcmask 457728  }
  0xa4   : > { %v617_v45 = vsel %vm615_vm9, %v614_v44, %v587_v17  ;;  %v616_v46 = vsel %vm615_vm9, %v613_v43, %v586_v16  ;;  %v1965_v42 = vld [vmem:[%s2611_s4 + $0x18] sm:$0xff]   ;;  %v1966_v43 = vld [vmem:[%s2611_s4 + $0x60] sm:$0xff]   ;;  %vm976_vm9 = vcmask 449536  }
  0xa5   : > { %v555_v47 = vpop.permute.xlu1 %554  ;;  %v553_v48 = vpop.permute.xlu0 %552  ;;  %v634_v49 = vmul.f32 %v617_v45, %v495_v38  ;;  %v633_v51 = vmul.f32 %v616_v46, %v494_v40  ;;  %v1963_v40 = vld [vmem:[%s2611_s4 + $0x10] sm:$0xff]   ;;  %v1967_v44 = vld [vmem:[%s2611_s4 + $0x20] sm:$0xff]   ;;  %v1968_v45 = vld [vmem:[%s2611_s4 + $0x68] sm:$0xff]  }
  0xa6   : > { %v557_v53 = vsel %vm556_vm10, %v553_v48, %v555_v47  ;;  %v560_v54 = vsel %vm556_vm10, %v555_v47, %v553_v48  ;;  %v1969_v46 = vld [vmem:[%s2611_s4 + $0x28] sm:$0xff]   ;;  %v1970_v47 = vld [vmem:[%s2611_s4 + $0x70] sm:$0xff]   ;;  %vm1007_vm10 = vcmask 588800  }
  0xa7   : > { %v642_v55 = vpack.c.bf16 %v636_v50, %v634_v49  ;;  %v641_v56 = vpack.c.bf16 %v635_v52, %v633_v51  ;;  %v603_v57 = vrot.slane %v557_v53, 6  ;;  %v604_v58 = vrot.slane %v560_v54, 6  ;;  %v1971_v48 = vld [vmem:[%s2611_s4 + $0x30] sm:$0xff]   ;;  %v1972_v49 = vld [vmem:[%s2611_s4 + $0x78] sm:$0xff]  }
  0xa8   : > { %v1973_v50 = vld [vmem:[%s2611_s4 + $0x38] sm:$0xff]  }
  0xa9   : > { %v564_v59 = vpop.permute.xlu1 %563  ;;  %662 = vmatprep.subr.bf16.mxu1 %v642_v55  ;;  %v562_v60 = vpop.permute.xlu0 %561  ;;  %v628_v3 = vsel %vm627_vm12, %v598_v27, %v603_v57  ;;  %v629_v4 = vsel %vm627_vm12, %v599_v28, %v604_v58  ;;  %vm1230_vm12 = vcmask 261120  }
  0xaa   : > { %v566_v61 = vsel %vm565_vm11, %v562_v60, %v564_v59  ;;  %v569_v62 = vsel %vm565_vm11, %v564_v59, %v562_v60  ;;  %663 = vmatpush1.bf16.msra.mxu1 %v641_v56 }
  0xab   : > { %v608_v63 = vrot.slane %v566_v61, 3  ;;  %v609_v0 = vrot.slane %v569_v62, 3 }
  0xad   : > { %v631_v7 = vsel %vm630_vm13, %v628_v3, %v608_v63  ;;  %v632_v8 = vsel %vm630_vm13, %v629_v4, %v609_v0  ;;  %v573_v9 = vpop.permute.xlu1 %572  ;;  %v571_v10 = vpop.permute.xlu0 %570  ;;  %v2077_v4 = vmov 0.0   ;;  %vm1232_vm13 = vcmask 392192  }
  0xae   : > { %v637_v13 = vmul.f32 %v631_v7, %v498_v1  ;;  %v638_v14 = vmul.f32 %v632_v8, %v499_v2  ;;  %v575_v15 = vsel %vm574_vm14, %v571_v10, %v573_v9  ;;  %v579_v16 = vsel %vm574_vm14, %v573_v9, %v571_v10  ;;  %1769 = vmatprep.subr.bf16.mxu0 %v2077_v4  ;;  %v912_v10 = vld [vmem:[%s2614_s7] sm:$0xff] }
  0xaf   : > { %v639_v17 = vmul.f32 %v575_v15, %v500_v5  ;;  %v640_v18 = vmul.f32 %v579_v16, %v501_v6  ;;  %1779 = vmatprep.mubr.msk.bf16.mxu0 %vm2088_vm0, %v2077_v4  ;;  %v902_v16 = vld [vmem:[%s2612_s5 + $0x8] sm:$0xff]  ;;  %vm1235_vm14 = vcmask 654336  }
  0xb1   : > { %v643_v20 = vpack.c.bf16 %v639_v17, %v637_v13  ;;  %v644_v21 = vpack.c.bf16 %v640_v18, %v638_v14  ;;  %v901_v14 = vld [vmem:[%s2612_s5] sm:$0xff] }
  0xb3   : > { %v660_v22 = vand.u32 %v655_v19, %v644_v21  ;;  %v657_v23 = vand.u32 %v655_v19, %v643_v20 }
  0xb5   : > { %664 = vmatprep.subr.bf16.mxu1 %v660_v22 }
  0xb6   : > { %665 = vmatpush1.bf16.msra.mxu1 %v657_v23 }
  0xb7   : > { %1704 = vmatprep.subr.bf16.mxu1 %v1958_v31 }
  0xb9   : > { %1650 = vmatmul.mubr.msk.bf16.vlgmr.msra.gmra.mrb[0].mxu1 %vm650_vm15, %v502_v24 }
  0xba   : > { %1705 = vmatpush3.bf16.msra.mxu1 %v1959_v32 }
  0xbb   : > { %1706 = vmatprep.subr.bf16.mxu1 %v1960_v33  ;;  %v906_v33 = vld [vmem:[%s2612_s5 + $0x28] sm:$0xff] }
  0xbe   : > { %v648_v25 = vpop.permute.xlu0 %647  ;;  %1707 = vmatpush3.bf16.msra.mxu1 %v1961_v37 }
  0xbf   : > { %1708 = vmatprep.subr.bf16.mxu1 %v1962_v39 }
  0xc2   : > { %1709 = vmatpush3.bf16.msra.mxu1 %v1963_v40 }
  0xc3   : > { %1710 = vmatprep.subr.bf16.mxu1 %v1964_v41 }
  0xc6   : > { %1711 = vmatpush3.bf16.msra.mxu1 %v1965_v42 }
  0xc7   : > { %1712 = vmatprep.subr.bf16.mxu1 %v1966_v43 }
  0xca   : > { %1713 = vmatpush3.bf16.msra.mxu1 %v1967_v44  ;;  %v907_v44 = vld [vmem:[%s2612_s5 + $0x30] sm:$0xff] }
  0xcb   : > { %1714 = vmatprep.subr.bf16.mxu1 %v1968_v45 }
  0xce   : > { %1715 = vmatpush3.bf16.msra.mxu1 %v1969_v46  ;;  %v908_v46 = vld [vmem:[%s2612_s5 + $0x38] sm:$0xff] }
  0xcf   : > { %1716 = vmatprep.subr.bf16.mxu1 %v1970_v47 }
  0xd2   : > { %1717 = vmatpush3.bf16.msra.mxu1 %v1971_v48 }
  0xd3   : > { %1718 = vmatprep.subr.bf16.mxu1 %v1972_v49 }
  0xd6   : > { %1719 = vmatpush3.bf16.msra.mxu1 %v1973_v50 }
 0x18c   : > { %v696_v26 = vpop.f32.mrb[0].mxu1 }
 0x18d   : > { %v697_v27 = vadd.f32 %v696_v26, %v648_v25  ;;  %v698_v28 = vpop.f32.mrb[1].mxu1 }
 0x18e   : > { %v699_v29 = vadd.f32 %v698_v28, %v648_v25  ;;  %v700_v30 = vpop.f32.mrb[2].mxu1  ;;  %v903_v25 = vld [vmem:[%s2612_s5 + $0x10] sm:$0xff] }
 0x18f   : > { %v703_v34 = vmax.f32 %v697_v27, 0.0  ;;  %v701_v35 = vpop.f32.mrb[3].mxu1  ;;  %v904_v27 = vld [vmem:[%s2612_s5 + $0x18] sm:$0xff] }
 0x190   : > { %v704_v36 = vmax.f32 %v699_v29, 0.0 }
 0x192   : > { %v1890_v38 = vpack.i.bf16 %v704_v36, %v703_v34 }
 0x194   : > { %1891 = vrot.lane.b32.xlu1 %v1890_v38, %s2642_s17 }
 0x206   : > { %v1892_v51 = vpop.permute.xlu1 %1891 }
 0x207   : > { %v1894_v52 = vunpack.i.h.bf16 %v1892_v51  ;;  %v1893_v53 = vunpack.i.l.bf16 %v1892_v51 }
 0x209   : > { %v743_v54 = vsel %vm547_vm4, %v1893_v53, %v1894_v52  ;;  %v747_v55 = vsel %vm547_vm4, %v1894_v52, %v1893_v53  ;;  %vm929_vm4 = vcmask 64512   ;;  %v909_v52 = vld [vmem:[%s2612_s5 + $0x40] sm:$0xff] }
 0x20a   : > { %v748_v56 = vmax.f32 %v703_v34, %v743_v54  ;;  %v749_v57 = vmax.f32 %v704_v36, %v747_v55  ;;  %v905_v34 = vld [vmem:[%s2612_s5 + $0x20] sm:$0xff] }
 0x20c   : > { %v1895_v58 = vpack.i.bf16 %v749_v57, %v748_v56 }
 0x20e   : > { %1896 = vrot.lane.b32.xlu1 %v1895_v58, %s2643_s0 }
 0x280   : > { %v1897_v59 = vpop.permute.xlu1 %1896 }
 0x281   : > { %v1899_v60 = vunpack.i.h.bf16 %v1897_v59  ;;  %v1898_v61 = vunpack.i.l.bf16 %v1897_v59 }
 0x283   : > { %v756_v62 = vsel %vm565_vm11, %v1898_v61, %v1899_v60  ;;  %v760_v63 = vsel %vm565_vm11, %v1899_v60, %v1898_v61  ;;  %v1974_v60 = vld [vmem:[%s2613_s6] sm:$0xff]  }
 0x284   : > { %v761_v0 = vmax.f32 %v748_v56, %v756_v62  ;;  %v762_v1 = vmax.f32 %v749_v57, %v760_v63 }
 0x286   : > { %v764_v2 = vpack.c.bf16 %v762_v1, %v762_v1  ;;  %v763_v3 = vpack.c.bf16 %v761_v0, %v761_v0 }
 0x288   : > { %893 = vmatprep.mubr.bf16.mxu1 %v764_v2 }
 0x289   : > { %894 = vmatmul.mubr.bf16.vlgmr.msra.gmra.mrb[4].mxu1 %v763_v3 }
 0x35c   : > { %v1720_v5 = vpop.f32.mrb[4].mxu1 }
 0x35d   : > { %v1721_v6 = vpop.f32.mrb[5].mxu1 }
 0x35e   : > { %v2360_v7 = vadd.f32 %v1721_v6, %v1720_v5  ;;  %v1723_v8 = vpop.f32.mrb[6].mxu1  ;;  %v1975_v6 = vld [vmem:[%s2615_s8] sm:$0xff]  }
 0x35f   : > { %v1724_v9 = vpop.f32.mrb[7].mxu1 }
 0x360   : > { %918 = vrot.lane.b32.xlu1 %v2360_v7, %s2078_s20  ;;  %915 = vrot.lane.b32.xlu0 %v2360_v7, %s2079_s30  ;;  %s2086_s20 = smov 57   ;;  %s2087_s30 = smov 121   ;;  %v982_v40 = vmul.f32 %v2360_v7, %v905_v34  ;;  %v1976_v9 = vld [vmem:[%s2615_s8 + $0x8] sm:$0xff]  }
 0x364   : > { %926 = vrot.lane.b32.xlu1 %v2360_v7, %s2080_s26  ;;  %923 = vrot.lane.b32.xlu0 %v2360_v7, %s2081_s23  ;;  %s2631_s26 = smov 56   ;;  %s2630_s23 = smov 120  }
 0x368   : > { %934 = vrot.lane.b32.xlu1 %v2360_v7, %s2082_s16  ;;  %931 = vrot.lane.b32.xlu0 %v2360_v7, %s2083_s1  ;;  %s2091_s16 = smov 55   ;;  %s2092_s1 = smov 119  }
 0x36c   : > { %942 = vrot.lane.b32.xlu1 %v2360_v7, %s2644_s2  ;;  %939 = vrot.lane.b32.xlu0 %v2360_v7, %s2084_s27  ;;  %s2096_s2 = smov 96   ;;  %s2097_s27 = smov 80  }
 0x370   : > { %949 = vrot.lane.b32.xlu1 %v2360_v7, %s2085_s25  ;;  %946 = vrot.lane.b32.xlu0 %v2360_v7, %s2642_s17 }
 0x374   : > { %957 = vrot.lane.b32.xlu1 %v2360_v7, %s2086_s20  ;;  %954 = vrot.lane.b32.xlu0 %v2360_v7, %s2087_s30  ;;  %s2094_s20 = smov 64   ;;  %s2095_s30 = smov 48  }
 0x378   : > { %965 = vrot.lane.b32.xlu1 %v2360_v7, %s2631_s26  ;;  %962 = vrot.lane.b32.xlu0 %v2360_v7, %s2630_s23 }
 0x37c   : > { %973 = vrot.lane.b32.xlu1 %v2360_v7, %s2091_s16  ;;  %970 = vrot.lane.b32.xlu0 %v2360_v7, %s2092_s1  ;;  %s485_s16 = sand.u32 1, %s2057_s19  }
 0x380   : > { %994 = vperm.xlu0 %1889, %v912_v10   ;;  %999 = vperm.xlu1 %1900, %v913_v11   ;;  %v1977_v11 = vld [vmem:[%s2615_s8 + $0x10] sm:$0xff]  }
 0x3d2   : > { %v919_v12 = vpop.permute.xlu1 %918  ;;  %v916_v13 = vpop.permute.xlu0 %915 }
 0x3d3   : > { %v922_v15 = vsel %vm921_vm3, %v916_v13, %v919_v12  ;;  %v1978_v12 = vld [vmem:[%s2615_s8 + $0x18] sm:$0xff]  }
 0x3d4   : > { %v978_v20 = vmul.f32 %v922_v15, %v901_v14 }
 0x3d6   : > { %v927_v17 = vpop.permute.xlu1 %926  ;;  %v924_v18 = vpop.permute.xlu0 %923 }
 0x3d7   : > { %v930_v19 = vsel %vm929_vm4, %v924_v18, %v927_v17 }
 0x3d8   : > { %v979_v21 = vmul.f32 %v930_v19, %v902_v16 }
 0x3da   : > { %v935_v22 = vpop.permute.xlu1 %934  ;;  %v932_v23 = vpop.permute.xlu0 %931  ;;  %v987_v24 = vpack.c.bf16 %v979_v21, %v978_v20 }
 0x3db   : > { %v938_v26 = vsel %vm937_vm6, %v932_v23, %v935_v22 }
 0x3dc   : > { %1770 = vmatpush3.bf16.msra.mxu0 %v987_v24  ;;  %v980_v31 = vmul.f32 %v938_v26, %v903_v25 }
 0x3dd   : > { %1771 = vmatprep.subr.bf16.mxu0 %v2077_v4 }
 0x3de   : > { %v943_v28 = vpop.permute.xlu1 %942  ;;  %v940_v29 = vpop.permute.xlu0 %939 }
 0x3df   : > { %v945_v30 = vsel %vm539_vm1, %v940_v29, %v943_v28  ;;  %vm960_vm1 = vcmask 465920  }
 0x3e0   : > { %v981_v32 = vmul.f32 %v945_v30, %v904_v27 }
 0x3e2   : > { %v950_v35 = vpop.permute.xlu1 %949  ;;  %v947_v36 = vpop.permute.xlu0 %946  ;;  %v988_v37 = vpack.c.bf16 %v981_v32, %v980_v31 }
 0x3e3   : > { %v953_v38 = vsel %vm952_vm7, %v947_v36, %v950_v35  ;;  %v1979_v35 = vld [vmem:[%s2616_s9 + $0x40] sm:$0xff]  }
 0x3e4   : > { %v983_v39 = vmul.f32 %v953_v38, %v906_v33  ;;  %1772 = vmatpush3.bf16.msra.mxu0 %v988_v37  ;;  %v1980_v36 = vld [vmem:[%s2616_s9] sm:$0xff]   ;;  %v1981_v37 = vld [vmem:[%s2616_s9 + $0x48] sm:$0xff]   ;;  %1737 = vmatprep.subr.bf16.mxu1 %v1979_v35 }
 0x3e5   : > { %1773 = vmatprep.subr.bf16.mxu0 %v2077_v4  ;;  %1738 = vmatpush3.bf16.msra.mxu1 %v1980_v36  ;;  %v1982_v38 = vld [vmem:[%s2616_s9 + $0x8] sm:$0xff]  }
 0x3e6   : > { %v958_v41 = vpop.permute.xlu1 %957  ;;  %v955_v42 = vpop.permute.xlu0 %954  ;;  %v989_v43 = vpack.c.bf16 %v983_v39, %v982_v40  ;;  %1739 = vmatprep.subr.bf16.mxu1 %v1981_v37  ;;  %v1983_v39 = vld [vmem:[%s2616_s9 + $0x50] sm:$0xff]  }
 0x3e7   : > { %v961_v45 = vsel %vm960_vm1, %v955_v42, %v958_v41  ;;  %v1984_v40 = vld [vmem:[%s2616_s9 + $0x10] sm:$0xff]   ;;  %v1985_v41 = vld [vmem:[%s2616_s9 + $0x58] sm:$0xff]  }
 0x3e8   : > { %1774 = vmatpush3.bf16.msra.mxu0 %v989_v43  ;;  %v984_v50 = vmul.f32 %v961_v45, %v907_v44  ;;  %v1986_v42 = vld [vmem:[%s2616_s9 + $0x18] sm:$0xff]   ;;  %v1987_v43 = vld [vmem:[%s2616_s9 + $0x60] sm:$0xff]   ;;  %v1989_v45 = vld [vmem:[%s2616_s9 + $0x68] sm:$0xff]  }
 0x3e9   : > { %1775 = vmatprep.subr.bf16.mxu0 %v2077_v4  ;;  %1740 = vmatpush3.bf16.msra.mxu1 %v1982_v38  ;;  %v1988_v44 = vld [vmem:[%s2616_s9 + $0x20] sm:$0xff]  }
 0x3ea   : > { %v966_v47 = vpop.permute.xlu1 %965  ;;  %v963_v48 = vpop.permute.xlu0 %962  ;;  %1741 = vmatprep.subr.bf16.mxu1 %v1983_v39 }
 0x3eb   : > { %v969_v49 = vsel %vm968_vm8, %v963_v48, %v966_v47  ;;  %v1990_v47 = vld [vmem:[%s2616_s9 + $0x28] sm:$0xff]  }
 0x3ec   : > { %v985_v51 = vmul.f32 %v969_v49, %v908_v46 }
 0x3ed   : > { %1742 = vmatpush3.bf16.msra.mxu1 %v1984_v40 }
 0x3ee   : > { %v974_v53 = vpop.permute.xlu1 %973  ;;  %v971_v54 = vpop.permute.xlu0 %970  ;;  %v990_v55 = vpack.c.bf16 %v985_v51, %v984_v50  ;;  %1743 = vmatprep.subr.bf16.mxu1 %v1985_v41 }
 0x3ef   : > { %v977_v56 = vsel %vm976_vm9, %v971_v54, %v974_v53 }
 0x3f0   : > { %v986_v57 = vmul.f32 %v977_v56, %v909_v52  ;;  %1776 = vmatpush3.bf16.msra.mxu0 %v990_v55 }
 0x3f1   : > { %1777 = vmatprep.subr.bf16.mxu0 %v2077_v4  ;;  %1744 = vmatpush3.bf16.msra.mxu1 %v1986_v42 }
 0x3f2   : > { %v991_v58 = vpack.c.bf16 %v986_v57, %v986_v57  ;;  %1745 = vmatprep.subr.bf16.mxu1 %v1987_v43 }
 0x3f4   : > { %v1012_v59 = vsel %vm621_vm5, %v991_v58, 0  ;;  %vm1126_vm5 = vcmask 523264  }
 0x3f5   : > { %1778 = vmatpush3.bf16.msra.mxu0 %v1012_v59  ;;  %1746 = vmatpush3.bf16.msra.mxu1 %v1988_v44 }
 0x3f6   : > { %1783 = vmatprep.subr.bf16.mxu0 %v2077_v4  ;;  %1747 = vmatprep.subr.bf16.mxu1 %v1989_v45 }
 0x3f8   : > { %1780 = vmatmul.mubr.msk.bf16.vlgmr.msra.gmra.mrb[0].mxu0 %vm1007_vm10, %v1974_v60 }
 0x3f9   : > { %1791 = vmatprep.mubr.msk.bf16.mxu0 %vm2088_vm0, %v2077_v4  ;;  %1784 = vmatpush3.bf16.msra.mxu0 %v1975_v6 }
 0x3fa   : > { %1785 = vmatprep.subr.bf16.mxu0 %v2077_v4  ;;  %1748 = vmatpush3.bf16.msra.mxu1 %v1990_v47 }
 0x3fd   : > { %1786 = vmatpush3.bf16.msra.mxu0 %v1976_v9 }
 0x3fe   : > { %1787 = vmatprep.subr.bf16.mxu0 %v2077_v4 }
 0x3ff   : > { %v995_v61 = vpop.permute.xlu0 %994  ;;  %v1000_v63 = vpop.permute.xlu1 %999 }
 0x401   : > { %1788 = vmatpush3.bf16.msra.mxu0 %v1977_v11  ;;  %v1993_v11 = vld [vmem:[%s2616_s9 + $0x78] sm:$0xff]  }
 0x402   : > { %1789 = vmatprep.subr.bf16.mxu0 %v2077_v4 }
 0x405   : > { %1790 = vmatpush3.bf16.msra.mxu0 %v1978_v12  ;;  %v1994_v12 = vld [vmem:[%s2616_s9 + $0x38] sm:$0xff]  }
 0x406   : > { %1795 = vmatprep.subr.bf16.mxu0 %v2077_v4 }
 0x4cb   : > { %v1048_v62 = vpop.f32.mrb[0].mxu0 }
 0x4cc   : > { %v1049_v0 = vadd.f32 %v1048_v62, %v995_v61  ;;  %v1781_v1 = vpop.f32.mrb[1].mxu0  ;;  %v1991_v61 = vld [vmem:[%s2616_s9 + $0x70] sm:$0xff]  }
 0x4cd   : > { %v1051_v2 = vpop.f32.mrb[2].mxu0  ;;  %1749 = vmatprep.subr.bf16.mxu1 %v1991_v61 }
 0x4ce   : > { %v1052_v3 = vadd.f32 %v1051_v2, %v1000_v63  ;;  %v1782_v5 = vpop.f32.mrb[3].mxu0  ;;  %v1055_v7 = vmax.f32 %v1049_v0, 0.0  ;;  %v1992_v2 = vld [vmem:[%s2616_s9 + $0x30] sm:$0xff]  }
 0x4cf   : > { %1750 = vmatpush3.bf16.msra.mxu1 %v1992_v2  ;;  %v2002_v2 = vld [vmem:[%s2620_s13 + $0x18] sm:$0xff]  }
 0x4d0   : > { %v1056_v8 = vmax.f32 %v1052_v3, 0.0  ;;  %1751 = vmatprep.subr.bf16.mxu1 %v1993_v11 }
 0x4d2   : > { %v1906_v10 = vpack.i.bf16 %v1056_v8, %v1055_v7 }
 0x4d3   : > { %1752 = vmatpush3.bf16.msra.mxu1 %v1994_v12 }
 0x4d4   : > { %1907 = vrot.lane.b32.xlu1 %v1906_v10, %s2085_s25  ;;  %1902 = vrot.lane.b32.xlu0 %v1906_v10, %s2642_s17  ;;  %s2645_s17 = smov 56   ;;  %s2646_s25 = smov 120  }
 0x546   : > { %v1908_v13 = vpop.permute.xlu1 %1907  ;;  %v1903_v14 = vpop.permute.xlu0 %1902 }
 0x547   : > { %v1910_v15 = vunpack.i.h.bf16 %v1908_v13  ;;  %v1909_v16 = vunpack.i.l.bf16 %v1908_v13  ;;  %v1905_v17 = vunpack.i.h.bf16 %v1903_v14  ;;  %v1904_v18 = vunpack.i.l.bf16 %v1903_v14  ;;  %v1995_v13 = vld [vmem:[%s2618_s11] sm:$0xff]   ;;  %v1996_v14 = vld [vmem:[%s2618_s11 + $0x8] sm:$0xff]  }
 0x549   : > { %v1080_v19 = vsel %vm952_vm7, %v1905_v17, %v1910_v15  ;;  %v1079_v20 = vsel %vm952_vm7, %v1904_v18, %v1909_v16 }
 0x54a   : > { %v1082_v21 = vmax.f32 %v1056_v8, %v1080_v19  ;;  %v1081_v22 = vmax.f32 %v1055_v7, %v1079_v20 }
 0x54c   : > { %v1916_v23 = vpack.i.bf16 %v1082_v21, %v1081_v22 }
 0x54e   : > { %1917 = vrot.lane.b32.xlu1 %v1916_v23, %s2645_s17  ;;  %1912 = vrot.lane.b32.xlu0 %v1916_v23, %s2646_s25  ;;  %s2093_s17 = smov 32   ;;  %s2647_s25 = smov 16  }
 0x5c0   : > { %v1918_v24 = vpop.permute.xlu1 %1917  ;;  %v1913_v25 = vpop.permute.xlu0 %1912 }
 0x5c1   : > { %v1920_v26 = vunpack.i.h.bf16 %v1918_v24  ;;  %v1919_v27 = vunpack.i.l.bf16 %v1918_v24  ;;  %v1915_v28 = vunpack.i.h.bf16 %v1913_v25  ;;  %v1914_v29 = vunpack.i.l.bf16 %v1913_v25 }
 0x5c3   : > { %v1098_v30 = vsel %vm968_vm8, %v1915_v28, %v1920_v26  ;;  %v1097_v31 = vsel %vm968_vm8, %v1914_v29, %v1919_v27 }
 0x5c4   : > { %v1100_v32 = vmax.f32 %v1082_v21, %v1098_v30  ;;  %v1099_v33 = vmax.f32 %v1081_v22, %v1097_v31 }
 0x5c6   : > { %v1101_v34 = vpack.c.bf16 %v1100_v32, %v1099_v33 }
 0x5c8   : > { %1792 = vmatmul.mubr.msk.bf16.vlgmr.msra.gmra.mrb[4].mxu0 %vm1126_vm5, %v1101_v34 }
 0x5c9   : > { %1803 = vmatprep.mubr.msk.bf16.mxu0 %vm2088_vm0, %v2077_v4  ;;  %1796 = vmatpush3.bf16.msra.mxu0 %v1995_v13 }
 0x5ca   : > { %1797 = vmatprep.subr.bf16.mxu0 %v2077_v4 }
 0x5cd   : > { %1798 = vmatpush3.bf16.msra.mxu0 %v1996_v14 }
 0x5ce   : > { %1799 = vmatprep.subr.bf16.mxu0 %v2077_v4 }
 0x69b   : > { %v1164_v46 = vpop.f32.mrb[4].mxu0 }
 0x69c   : > { %v1793_v48 = vpop.f32.mrb[5].mxu0  ;;  %v1176_v49 = vrot.slane %v1164_v46, 2  ;;  %v1172_v50 = vrot.slane %v1164_v46, 1  ;;  %v1184_v52 = vrot.slane %v1164_v46, 4  ;;  %v1180_v53 = vrot.slane %v1164_v46, 3 }
 0x69d   : > { %v1167_v51 = vpop.f32.mrb[6].mxu0  ;;  %v1192_v54 = vrot.slane %v1164_v46, 6  ;;  %v1188_v55 = vrot.slane %v1164_v46, 5  ;;  %v1196_v0 = vrot.slane %v1164_v46, 7 }
 0x69e   : > { %v1794_v56 = vpop.f32.mrb[7].mxu0  ;;  %v1205_v57 = vrot.slane %v1167_v51, 2  ;;  %v1201_v58 = vrot.slane %v1167_v51, 1  ;;  %v1213_v59 = vrot.slane %v1167_v51, 4  ;;  %v1209_v60 = vrot.slane %v1167_v51, 3 }
 0x69f   : > { %v1221_v62 = vrot.slane %v1167_v51, 6  ;;  %v1217_v63 = vrot.slane %v1167_v51, 5  ;;  %v1225_v1 = vrot.slane %v1167_v51, 7 }
 0x6a0   : > { %v1926_v3 = vpack.i.bf16 %v1176_v49, %v1205_v57  ;;  %v1921_v5 = vpack.i.bf16 %v1172_v50, %v1201_v58  ;;  %v1936_v6 = vpack.i.bf16 %v1184_v52, %v1213_v59  ;;  %v1931_v7 = vpack.i.bf16 %v1180_v53, %v1209_v60  ;;  %v1997_v52 = vld [vmem:[%s2618_s11 + $0x10] sm:$0xff]   ;;  %v1998_v53 = vld [vmem:[%s2618_s11 + $0x18] sm:$0xff]  }
 0x6a1   : > { %v1946_v8 = vpack.i.bf16 %v1192_v54, %v1221_v62  ;;  %v1941_v9 = vpack.i.bf16 %v1188_v55, %v1217_v63  ;;  %v1951_v10 = vpack.i.bf16 %v1196_v0, %v1225_v1  ;;  %1800 = vmatpush3.bf16.msra.mxu0 %v1997_v52  ;;  %v1281_v55 = vld [vmem:[%s2617_s10] sm:$0x1]  ;;  %v2000_v0 = vld [vmem:[%s2620_s13 + $0x8] sm:$0xff]   ;;  %v2001_v1 = vld [vmem:[%s2620_s13 + $0x10] sm:$0xff]  }
 0x6a2   : > { %1927 = vrot.lane.b32.xlu1 %v1926_v3, %s2093_s17  ;;  %1922 = vrot.lane.b32.xlu0 %v1921_v5, %s2647_s25  ;;  %v1999_v62 = vld [vmem:[%s2620_s13] sm:$0xff]   ;;  %s1700_s25 = sshll.u32 %s2200_s22, 4  ;;  %s1577_s22 = scalar_lea.sflag [#allocation3], %s485_s16 }
 0x6a3   : > { %1801 = vmatprep.subr.bf16.mxu0 %v2077_v4  ;;  %v1428_v3 = vld [vmem:[%s2619_s12] sm:$0x1]  ;;  %s2565_s23 = scalar_lea.hbm %s2622_s15, %s1700_s25 }
 0x6a5   : > { %1802 = vmatpush3.bf16.msra.mxu0 %v1998_v53 }
 0x6a6   : > { %1937 = vrot.lane.b32.xlu1 %v1936_v6, %s2094_s20  ;;  %1932 = vrot.lane.b32.xlu0 %v1931_v7, %s2095_s30  ;;  %s2098_s30 = smov [#allocation2]  }
 0x6a7   : > { %1807 = vmatprep.subr.bf16.mxu0 %v2077_v4  ;;  %s2007_s1 = sshll.u32 %s2098_s30, 4  ;;  %s2008_s1 = int_to_ptr.vmem [resolvable:$false] %s2007_s1 }
 0x6a8   : > { %s2009_s17 = scalar_lea.vmem %s2008_s1, 32 }
 0x6aa   : > { %1947 = vrot.lane.b32.xlu1 %v1946_v8, %s2096_s2  ;;  %1942 = vrot.lane.b32.xlu0 %v1941_v9, %s2097_s27  ;;  %s486_s2 = scalar_lea.vmem [#allocation2], %s485_s16 }
 0x6ab   : > { %s1589_s27 = sshll.u32 %s486_s2, 4  ;;  %s2567_s27 = int_to_ptr.vmem [resolvable:$true] %s1589_s27 }
 0x6ac   : > { %s2003_s20 = scalar_lea.vmem %s2567_s27, 16  ;;  %p2010_p0 = scmp.lt.s32.totalorder %s2567_s27, %s2008_s1 }
 0x6ad   : > { %p2004_p11 = scmp.ne.s32.totalorder %s2567_s27, %s2003_s20  ;;  %p2011_p1 = scmp.lt.s32.totalorder %s2009_s17, %s2003_s20 }
 0x6ae   : > { %1952 = vrot.lane.b32.xlu0 %v1951_v10, %s2643_s0 }
 0x6af   : > { %p2005_p12 = pnand %p2004_p11, %p2217_p5  ;;  %p2012_p2 = por %p2011_p1, %p2010_p0 }
 0x6b1   : > { %p2006_p13 = pneg %p2005_p12 }
 0x6b3   : > { %p2013_p3 = pnand %p2012_p2, %p2006_p13 }
 0x714   : > { %v1928_v15 = vpop.permute.xlu1 %1927  ;;  %v1923_v16 = vpop.permute.xlu0 %1922 }
 0x715   : > { %v1925_v17 = vunpack.i.h.bf16 %v1923_v16  ;;  %v1924_v18 = vunpack.i.l.bf16 %v1923_v16  ;;  %v1930_v19 = vunpack.i.h.bf16 %v1928_v15  ;;  %v1929_v20 = vunpack.i.l.bf16 %v1928_v15 }
 0x717   : > { %v1229_v21 = vsel %vm521_vm2, %v1164_v46, %v1925_v17  ;;  %v1240_v22 = vsel %vm521_vm2, %v1167_v51, %v1924_v18  ;;  %vm1237_vm2 = vcmask 785408  }
 0x718   : > { %v1938_v23 = vpop.permute.xlu1 %1937  ;;  %v1933_v24 = vpop.permute.xlu0 %1932  ;;  %v1231_v29 = vsel %vm1230_vm12, %v1229_v21, %v1930_v19  ;;  %v1241_v30 = vsel %vm1230_vm12, %v1240_v22, %v1929_v20 }
 0x719   : > { %v1935_v25 = vunpack.i.h.bf16 %v1933_v24  ;;  %v1934_v26 = vunpack.i.l.bf16 %v1933_v24  ;;  %v1940_v27 = vunpack.i.h.bf16 %v1938_v23  ;;  %v1939_v28 = vunpack.i.l.bf16 %v1938_v23 }
 0x71b   : > { %v1233_v31 = vsel %vm1232_vm13, %v1231_v29, %v1935_v25  ;;  %v1242_v32 = vsel %vm1232_vm13, %v1241_v30, %v1934_v26 }
 0x71c   : > { %v1948_v33 = vpop.permute.xlu1 %1947  ;;  %v1943_v34 = vpop.permute.xlu0 %1942  ;;  %v1234_v39 = vsel %vm1126_vm5, %v1233_v31, %v1940_v27  ;;  %v1243_v40 = vsel %vm1126_vm5, %v1242_v32, %v1939_v28 }
 0x71d   : > { %v1945_v35 = vunpack.i.h.bf16 %v1943_v34  ;;  %v1944_v36 = vunpack.i.l.bf16 %v1943_v34  ;;  %v1950_v37 = vunpack.i.h.bf16 %v1948_v33  ;;  %v1949_v38 = vunpack.i.l.bf16 %v1948_v33 }
 0x71f   : > { %v1236_v41 = vsel %vm1235_vm14, %v1234_v39, %v1945_v35  ;;  %v1244_v42 = vsel %vm1235_vm14, %v1243_v40, %v1944_v36 }
 0x720   : > { %v1953_v43 = vpop.permute.xlu0 %1952  ;;  %v1238_v46 = vsel %vm1237_vm2, %v1236_v41, %v1950_v37  ;;  %v1245_v47 = vsel %vm1237_vm2, %v1244_v42, %v1949_v38 }
 0x721   : > { %v1955_v44 = vunpack.i.h.bf16 %v1953_v43  ;;  %v1954_v45 = vunpack.i.l.bf16 %v1953_v43 }
 0x723   : > { %v1239_v48 = vsel %vm565_vm11, %v1238_v46, %v1955_v44  ;;  %v1246_v49 = vsel %vm565_vm11, %v1245_v47, %v1954_v45  ;;  %vm1574_vm11 = vcmask 73728  }
 0x724   : > { %v1247_v50 = vpack.c.bf16 %v1239_v48, %v1239_v48  ;;  %v1248_v51 = vpack.c.bf16 %v1246_v49, %v1246_v49 }
 0x726   : > { %1410 = vmatprep.mubr.bf16.mxu1 %v1248_v51 }
 0x727   : > { %1411 = vmatmul.mubr.bf16.vlgmr.msra.gmra.mrb[8].mxu1 %v1247_v50 }
 0x7fa   : > { %v1753_v54 = vpop.f32.mrb[8].mxu1 }
 0x7fb   : > { %v1754_v56 = vpop.f32.mrb[9].mxu1 }
 0x7fc   : > { %v1755_v57 = vadd.f32 %v1754_v56, %v1753_v54  ;;  %v1756_v58 = vpop.f32.mrb[10].mxu1 }
 0x7fd   : > { %v1757_v59 = vpop.f32.mrb[11].mxu1 }
 0x7fe   : > { %v1413_v60 = vadd.f32 %v1755_v57, %v1281_v55 }
 0x800   : > { %v1418_v61 = vmax.f32 %v1413_v60, 0.0 }
 0x802   : > { %v1419_v63 = vpack.c.bf16 %v1418_v61, %v1418_v61 }
 0x804   : > { %1804 = vmatmul.mubr.msk.bf16.vlgmr.msra.gmra.mrb[8].mxu0 %vm1126_vm5, %v1419_v63 }
 0x805   : > { %1808 = vmatpush3.bf16.msra.mxu0 %v1999_v62  ;;  %1815 = vmatprep.mubr.msk.bf16.mxu0 %vm2088_vm0, %v2077_v4 }
 0x806   : > { %1809 = vmatprep.subr.bf16.mxu0 %v2077_v4 }
 0x809   : > { %1810 = vmatpush3.bf16.msra.mxu0 %v2000_v0 }
 0x80a   : > { %1811 = vmatprep.subr.bf16.mxu0 %v2077_v4 }
 0x80d   : > { %1812 = vmatpush3.bf16.msra.mxu0 %v2001_v1 }
 0x80e   : > { %1813 = vmatprep.subr.bf16.mxu0 %v2077_v4  ;;  %v1506_v4 = vld [vmem:[%s2621_s14] sm:$0x1] }
 0x811   : > { %1814 = vmatpush3.bf16.msra.mxu0 %v2002_v2 }
 0x8d7   : > { %v1490_v5 = vpop.f32.mrb[8].mxu0 }
 0x8d8   : > { %v1491_v6 = vadd.f32 %v1490_v5, %v1428_v3  ;;  %v1805_v7 = vpop.f32.mrb[9].mxu0 }
 0x8d9   : > { %v1493_v8 = vpop.f32.mrb[10].mxu0 }
 0x8da   : > { %v1496_v9 = vmax.f32 %v1491_v6, 0.0  ;;  %v1806_v10 = vpop.f32.mrb[11].mxu0 }
 0x8dc   : > { %v1497_v11 = vpack.c.bf16 %v1496_v9, %v1496_v9 }
 0x8de   : > { %1816 = vmatmul.mubr.msk.bf16.vlgmr.msra.gmra.mrb[12].mxu0 %vm1126_vm5, %v1497_v11 }
 0x9b1   : > { %v1568_v12 = vpop.f32.mrb[12].mxu0 }
 0x9b2   : > { %v1569_v13 = vadd.f32 %v1568_v12, %v1506_v4  ;;  %v1817_v14 = vpop.f32.mrb[13].mxu0 }
 0x9b3   : > { %v1571_v15 = vpop.f32.mrb[14].mxu0 }
 0x9b4   : > { %v1818_v16 = vpop.f32.mrb[15].mxu0  ;;  %1575 = vst.msk [vmem:[%s486_s2] sm:$0x1] %vm1574_vm11, %v1569_v13 }
 0x9b5   : > { %2016 = shalt.err (!%p2013_p3)
}
 0x9b6   : > { %s2017_s16 = scalar_lea.hbm %s2565_s23, 16  ;;  %s2021_s0 = scalar_lea.hbm %s2622_s15, 32 }
 0x9b7   : > { %p2018_p4 = scmp.ne.s32.totalorder %s2565_s23, %s2017_s16  ;;  %p2022_p9 = scmp.lt.u32.totalorder %s2565_s23, %s2622_s15 }
 0x9b8   : > { %p2023_p10 = scmp.lt.u32.totalorder %s2021_s0, %s2017_s16  ;;  %p2025_p12 = scmp.lt.u32.totalorder %s2017_s16, %s2565_s23 }
 0x9b9   : > { %p2019_p7 = pnand %p2018_p4, %p2217_p5 }
 0x9ba   : > { %p2024_p11 = por %p2023_p10, %p2022_p9 }
 0x9bb   : > { %p2020_p8 = pneg %p2019_p7 }
 0x9bc   : > { %p2026_p13 = por %p2025_p12, %p2024_p11 }
 0x9be   : > { %p2027_p0 = pnand %p2026_p13, %p2020_p8 }
 0x9c0   : > { %2030 = shalt.err (!%p2027_p0)
}
 0x9c1   : > { %1819 = dma.vmem_to_hbm [thread:$0]  (%p2217_p5), %s2567_s27, 16, %s2565_s23, %s1577_s22  }
 0x9c2 PF: > { %p1825_p1 = scmp.ge.s32.totalorder %s2065_s21, 2  ;;  %s1601_s20 = sand.u32 1, %s2053_s18  }
 0x9c3   : > { %s1602_s1 = scalar_lea.sflag [#allocation3], %s1601_s20 }
 0x9c4   : > { %p1822_p2 = pnand %p1825_p1, %p2221_p6 }
 0x9c6   : > { %2048 = dma.done.wait (!%p1822_p2), %s1602_s1, 16  }
 0x9c7   : > { %2050 = vsyncadd (!%p1822_p2), %s1602_s1, 4294967280  ;;  %s2648_s17 = sld [smem:[#allocation5_spill]]  ;;  %s2649_s20 = sld [smem:[#allocation6_spill]] }
 0x9c8   : > { %p25_p3 = scmp.ge.s32.totalorder %s2204_s24, 4   ;;  %s2650_s18 = smov %s2057_s19 }
 0x9c9   : > { %s2652_s21 = smov %s2204_s24 }
 0x9ca   :  { %27 = sbr.rel (!%p25_p3) target bundleno = 7 (0x7), region = 115 }
 0x9cd   : > { %s2651_s19 = smov %s2648_s17 }
 0x9d1   :  { %1606 = vsyncpa [#allocation3], 1 }
 0x9d2   :  { %1608 = vsyncpa [#allocation3 + $0x1], 1 }

</bundles_post_ra>
